<compile_context>
chip_gen: v7x
topology: tpu7x:2x2x1
jax: 0.10.0
libtpu: 0.0.40
codegen_flags: <defaults>
</compile_context>

<pallas_src>
import numpy as np
import jax
import jax.numpy as jnp
from jax.experimental import pallas as pl
from jax.experimental.pallas import tpu as pltpu

_LANE = 128
_SUB = 8
_LOG_LO = float(np.log(1e-9))
_LOG_HI = float(np.log1p(-1e-9))


# ---------------- tree helpers (same semantics as the PyTorch module) ----------------
def get_children(target_parent_idx, parent_indexes):
    return [i for i, p in enumerate(parent_indexes) if p == target_parent_idx]


def get_children_list_deep(target_parent_idx, children_list):
    out = list(children_list[target_parent_idx])
    for c in children_list[target_parent_idx]:
        out += get_children_list_deep(c, children_list)
    return out


def get_path_from_root(idx, parent_list):
    if idx != 0:
        return get_path_from_root(parent_list[idx], parent_list) + [idx]
    return []


def get_nb_nn_outputs(children_list):
    k = 0
    for node in children_list:
        if len(node) == 2:
            k += 1
        elif len(node) >= 3:
            k += len(node)
    return k


def _rup(x, m):
    return ((x + m - 1) // m) * m


# ---------------- static structure matrices (padded, bf16) ----------------
def build_hierarchy_constants(parent_list):
    n = len(parent_list)
    childrens = [get_children(i, parent_list) for i in range(n)]
    deep = [get_children_list_deep(i, childrens) for i in range(n)]
    paths = [get_path_from_root(i, parent_list) for i in range(n)]
    leafs = [i for i, c in enumerate(childrens) if not c]
    internal = [i for i in range(1, n) if childrens[i]]
    K = get_nb_nn_outputs(childrens)
    L = len(leafs)
    NI = len(internal)

    Kp = _rup(max(K, 1), _LANE)
    Np = _rup(n, _LANE)
    Lp = _rup(max(L, 1), _LANE)
    NIp = _rup(max(NI, 1), _LANE)

    E = np.zeros((Kp, Np), np.float32)
    G = np.zeros((Np, Np), np.float32)
    start = 0
    for par, ch in enumerate(childrens):
        if not ch:
            continue
        if len(ch) == 2:
            E[start, ch[0]] = 1.0          # second child keeps logit 0
            start += 1
        elif len(ch) >= 3:
            for j, c in enumerate(ch):
                E[start + j, c] = 1.0
            start += len(ch)
        for a in ch:
            for b in ch:
                G[a, b] = 1.0
    G[0, 0] = 1.0
    for i in range(n, Np):
        G[i, i] = 1.0                      # keep padded denominators finite

    D = np.zeros((Lp, Np), np.float32)
    for lbl, leaf in enumerate(leafs):
        binv = np.zeros(n, np.int64)
        cur = leaf
        while cur != 0:
            binv[cur] = 1
            cur = parent_list[cur]
        for idx in range(1, n):            # idx 0 excluded (loss loop starts at 1)
            D[lbl, idx] = binv[[idx] + deep[idx]].sum()

    P = np.zeros((Np, NIp), np.float32)    # pruned: only internal-node columns
    for j, idx in enumerate(internal):
        for a in paths[idx]:
            P[a, j] = 1.0

    MASK = np.zeros((1, NIp), np.float32)  # masks padded internal columns
    MASK[0, :NI] = 1.0

    return dict(
        E=jnp.asarray(E, jnp.bfloat16),
        G=jnp.asarray(G, jnp.bfloat16),
        D=jnp.asarray(D, jnp.bfloat16),
        P=jnp.asarray(P, jnp.bfloat16),
        MASK=jnp.asarray(MASK, jnp.float32),
        meta=dict(n=n, K=K, L=L, NI=NI, Kp=Kp, Np=Np, Lp=Lp, NIp=NIp,
                  childrens=childrens, deep=deep, paths=paths, leafs=leafs),
    )


# ---------------- Pallas kernel (one batch tile per grid step) ----------------
def _hloss_tile_kernel(u_ref, oh_ref, e_ref, g_ref, d_ref, p_ref, mask_ref, out_ref):
    u = u_ref[...]                                         # (TB, Kp) f32
    oh = oh_ref[...]                                       # (TB, Lp) bf16

    # Effective logits. E is a 0/1 scatter matrix; keep activations in f32 so the
    # selection is exact, constants stored bf16 and promoted in-register.
    z = jnp.dot(u, e_ref[...].astype(jnp.float32),
                preferred_element_type=jnp.float32)        # (TB, Np)
    ez = jnp.exp(z)
    denom = jnp.dot(ez, g_ref[...].astype(jnp.float32),
                    preferred_element_type=jnp.float32)    # (TB, Np)
    # Log-space group softmax / sigmoid with the reference clamp [1e-9, 1-1e-9]
    # (no divide, no probability materialization).
    logp = jnp.clip(z - jnp.log(denom), _LOG_LO, _LOG_HI)  # (TB, Np)

    # Cross-entropy-like term: -sum_idx descendant_label_sum[idx] * log p[idx].
    # one-hot (0/1) x small-integer D -> exact pure-bf16 MXU pass, f32 accumulation.
    d = jnp.dot(oh, d_ref[...], preferred_element_type=jnp.float32)       # (TB, Np)
    l1 = -jnp.sum(d * logp, axis=-1, keepdims=True)                       # (TB, 1)

    # Path-product term over internal nodes only (P pruned to internal columns).
    logprod = jnp.dot(logp, p_ref[...].astype(jnp.float32),
                      preferred_element_type=jnp.float32)                 # (TB, NIp)
    l2 = jnp.sum(mask_ref[...] * jnp.exp(logprod), axis=-1, keepdims=True)

    # Padded batch rows have an all-zero one-hot -> row-sum is the validity mask.
    valid = jnp.sum(oh.astype(jnp.float32), axis=-1, keepdims=True)       # (TB, 1)
    tile_sum = jnp.sum((l1 + l2) * valid)                                 # scalar

    # Lane-dense (8, 128) partial-sum block (avoids masked last-dim-1 stores).
    out_ref[...] = jnp.full((_SUB, _LANE), tile_sum, dtype=jnp.float32)


# ---------------- wrapper ----------------
def hierarchical_loss(logits, targets, consts, *, block_b=256):
    """Mean hierarchical loss over the batch (matches HierarchicalLoss.forward).

    block_b: batch-tile size. 256 fills the v6e/v7x MXU; raise to 1024-2048 on
    v6e (128 MiB VMEM) for better DMA pipelining.
    """
    meta = consts["meta"]
    K, L = meta["K"], meta["L"]
    Kp, Np, Lp, NIp = meta["Kp"], meta["Np"], meta["Lp"], meta["NIp"]

    B = int(logits.shape[0])
    assert logits.shape[1] == K, "wrong number of nn outputs for this hierarchy"
    block_b = max(_SUB, _rup(int(block_b), _SUB))
    Bp = _rup(max(B, 1), block_b)
    num_tiles = Bp // block_b

    u = jnp.zeros((Bp, Kp), jnp.float32).at[:B, :K].set(logits.astype(jnp.float32))
    oh = jnp.zeros((Bp, Lp), jnp.bfloat16).at[jnp.arange(B), targets].set(
        jnp.ones((B,), jnp.bfloat16))

    # VMEM budget: double-buffered pipeline copies of every block + headroom for
    # the in-kernel f32 temporaries.
    blk_bytes = (block_b * Kp * 4 + block_b * Lp * 2 +
                 Kp * Np * 2 + Np * Np * 2 + Lp * Np * 2 + Np * NIp * 2 +
                 NIp * 4 + _SUB * _LANE * 4)
    vmem_limit = 2 * blk_bytes + 10 * block_b * Np * 4
    vmem_limit = int(min(max(vmem_limit, 32 << 20), 100 << 20))

    def const_spec(shape):
        return pl.BlockSpec(shape, lambda i: (0, 0))       # VMEM-resident constant

    partial = pl.pallas_call(
        _hloss_tile_kernel,
        out_shape=jax.ShapeDtypeStruct((num_tiles * _SUB, _LANE), jnp.float32),
        grid=(num_tiles,),
        in_specs=[
            pl.BlockSpec((block_b, Kp), lambda i: (i, 0)),  # u        (batch-tiled)
            pl.BlockSpec((block_b, Lp), lambda i: (i, 0)),  # one-hot  (batch-tiled)
            const_spec((Kp, Np)),                           # E
            const_spec((Np, Np)),                           # G
            const_spec((Lp, Np)),                           # D
            const_spec((Np, NIp)),                          # P (internal columns)
            const_spec((1, NIp)),                           # internal-column mask
        ],
        out_specs=pl.BlockSpec((_SUB, _LANE), lambda i: (i, 0)),
        compiler_params=pltpu.CompilerParams(
            dimension_semantics=("parallel",),
            vmem_limit_bytes=vmem_limit),
    )(u, oh, consts["E"], consts["G"], consts["D"], consts["P"], consts["MASK"])

    # Every element of block i equals that tile's masked loss sum.
    tile_sums = partial.reshape(num_tiles, _SUB, _LANE)[:, 0, 0]
    return jnp.sum(tile_sums) / B


# ---------------- numpy/float64 reference (mirrors the PyTorch forward) ----------------
def reference_loss(logits_np, targets_np, parent_list, childrens, deep, paths, leafs):
    n = len(parent_list)
    losses = []
    for i in range(logits_np.shape[0]):
        u_s = logits_np[i]
        probas = np.zeros((n, n), np.float64)
        start = 0
        for par, ch in enumerate(childrens):
            if not ch:
                continue
            if len(ch) == 2:
                e = np.exp(u_s[start])
                pr = e / (1.0 + e)
                probas[par, ch[0]] = pr
                probas[par, ch[1]] = 1.0 - pr
                start += 1
            elif len(ch) >= 3:
                e = np.exp(u_s[start:start + len(ch)])
                probas[par, ch] = e / e.sum()
                start += len(ch)
        probas = np.clip(probas, 1e-9, 1.0 - 1e-9)

        binv = np.zeros(n, np.int64)
        cur = leafs[int(targets_np[i])]
        while cur != 0:
            binv[cur] = 1
            cur = parent_list[cur]
        dls = [binv[[j] + deep[j]].sum() for j in range(n)]

        loss = 0.0
        for idx in range(1, n):
            loss -= dls[idx] * np.log(probas[parent_list[idx], idx])
            if childrens[idx]:
                prod = 1.0
                for a in paths[idx]:
                    prod *= probas[parent_list[a], a]
                loss += prod
        losses.append(loss)
    return float(np.mean(losses))


if __name__ == "__main__":
    # Example hierarchy:
    #   root(0) -> {1, 2}    (2 children => 1 sigmoid output)
    #   1       -> {3, 4}    (2 children => 1 sigmoid output)
    #   2       -> {5, 6, 7} (3 children => 3 softmax outputs)
    parent_list = [None, 0, 0, 1, 1, 2, 2, 2]
    consts = build_hierarchy_constants(parent_list)
    meta = consts["meta"]
    K, L = meta["K"], meta["L"]          # 5 nn outputs, 5 leaf classes

    key = jax.random.PRNGKey(0)
    k1, k2, k3, k4 = jax.random.split(key, 4)

    # --- small check: batch = 2, single grid step ---
    B1 = 2
    logits1 = jax.random.normal(k1, (B1, K), dtype=jnp.float32)
    targets1 = jax.random.randint(k2, (B1,), 0, L)
    loss1 = float(jax.block_until_ready(hierarchical_loss(logits1, targets1, consts)))
    ref1 = reference_loss(np.asarray(logits1), np.asarray(targets1), parent_list,
                          meta["childrens"], meta["deep"], meta["paths"], meta["leafs"])
    assert np.allclose(loss1, ref1, rtol=1e-5, atol=1e-5), (loss1, ref1)

    # --- multi-tile check: 3 batch tiles of 128 rows + padded-row masking ---
    B2 = 300
    logits2 = jax.random.normal(k3, (B2, K), dtype=jnp.float32)
    targets2 = jax.random.randint(k4, (B2,), 0, L)
    loss2 = float(jax.block_until_ready(
        hierarchical_loss(logits2, targets2, consts, block_b=128)))
    ref2 = reference_loss(np.asarray(logits2), np.asarray(targets2), parent_list,
                          meta["childrens"], meta["deep"], meta["paths"], meta["leafs"])
    assert np.allclose(loss2, ref2, rtol=1e-4, atol=1e-4), (loss2, ref2)

    print("KERNEL_OK")
</pallas_src>

<mosaic_0001>
module attributes {stable_mosaic.version = 11 : i64} {
  func.func @_hloss_tile_kernel(%arg0: i32, %arg1: memref<256x128xf32, #tpu.memory_space<vmem>>, %arg2: memref<256x128xbf16, #tpu.memory_space<vmem>>, %arg3: memref<128x128xbf16, #tpu.memory_space<vmem>>, %arg4: memref<128x128xbf16, #tpu.memory_space<vmem>>, %arg5: memref<128x128xbf16, #tpu.memory_space<vmem>>, %arg6: memref<128x128xbf16, #tpu.memory_space<vmem>>, %arg7: memref<1x128xf32, #tpu.memory_space<vmem>>, %arg8: memref<8x128xf32, #tpu.memory_space<vmem>>) attributes {dimension_semantics = [#tpu.dimension_semantics<parallel>], iteration_bounds = array<i64: 1>, scalar_prefetch = 0 : i64, scratch_operands = 0 : i64, tpu.core_type = #tpu.core_type<tc>, window_params = [{transform_indices = @transform_0, window_bounds = array<i64: 256, 128>}, {transform_indices = @transform_1, window_bounds = array<i64: 256, 128>}, {pipeline_mode = #tpu.pipeline_mode<synchronous>, transform_indices = @transform_2, window_bounds = array<i64: 128, 128>}, {pipeline_mode = #tpu.pipeline_mode<synchronous>, transform_indices = @transform_3, window_bounds = array<i64: 128, 128>}, {pipeline_mode = #tpu.pipeline_mode<synchronous>, transform_indices = @transform_4, window_bounds = array<i64: 128, 128>}, {pipeline_mode = #tpu.pipeline_mode<synchronous>, transform_indices = @transform_5, window_bounds = array<i64: 128, 128>}, {pipeline_mode = #tpu.pipeline_mode<synchronous>, transform_indices = @transform_6, window_bounds = array<i64: 1, 128>}, {transform_indices = @transform_7, window_bounds = array<i64: 8, 128>}]} {
    %c0 = arith.constant 0 : index
    %c0_0 = arith.constant 0 : index
    %0 = vector.load %arg1[%c0, %c0_0] : memref<256x128xf32, #tpu.memory_space<vmem>>, vector<256x128xf32>
    %c0_1 = arith.constant 0 : index
    %c0_2 = arith.constant 0 : index
    %1 = vector.load %arg2[%c0_1, %c0_2] : memref<256x128xbf16, #tpu.memory_space<vmem>>, vector<256x128xbf16>
    %c0_3 = arith.constant 0 : index
    %c0_4 = arith.constant 0 : index
    %2 = vector.load %arg3[%c0_3, %c0_4] : memref<128x128xbf16, #tpu.memory_space<vmem>>, vector<128x128xbf16>
    %3 = arith.extf %2 : vector<128x128xbf16> to vector<128x128xf32>
    %cst = arith.constant dense<0.000000e+00> : vector<256x128xf32>
    %4 = tpu.matmul %0, %3, %cst {dimension_numbers = #tpu.dot_dimension_numbers<[1], [0], [0], [1], [0, 0, 1, 1], [], []>} : vector<256x128xf32>, vector<128x128xf32>, vector<256x128xf32> -> vector<256x128xf32>
    %5 = math.exp %4 : vector<256x128xf32>
    %c0_5 = arith.constant 0 : index
    %c0_6 = arith.constant 0 : index
    %6 = vector.load %arg4[%c0_5, %c0_6] : memref<128x128xbf16, #tpu.memory_space<vmem>>, vector<128x128xbf16>
    %7 = arith.extf %6 : vector<128x128xbf16> to vector<128x128xf32>
    %cst_7 = arith.constant dense<0.000000e+00> : vector<256x128xf32>
    %8 = tpu.matmul %5, %7, %cst_7 {dimension_numbers = #tpu.dot_dimension_numbers<[1], [0], [0], [1], [0, 0, 1, 1], [], []>} : vector<256x128xf32>, vector<128x128xf32>, vector<256x128xf32> -> vector<256x128xf32>
    %9 = math.log %8 : vector<256x128xf32>
    %10 = arith.subf %4, %9 : vector<256x128xf32>
    %cst_8 = arith.constant -20.7232666 : f32
    %cst_9 = arith.constant -9.99999971E-10 : f32
    %11 = vector.broadcast %cst_8 : f32 to vector<256x128xf32>
    %12 = arith.maximumf %11, %10 : vector<256x128xf32>
    %13 = vector.broadcast %cst_9 : f32 to vector<256x128xf32>
    %14 = arith.minimumf %13, %12 : vector<256x128xf32>
    %c0_10 = arith.constant 0 : index
    %c0_11 = arith.constant 0 : index
    %15 = vector.load %arg5[%c0_10, %c0_11] : memref<128x128xbf16, #tpu.memory_space<vmem>>, vector<128x128xbf16>
    %cst_12 = arith.constant dense<0.000000e+00> : vector<256x128xf32>
    %16 = tpu.matmul %1, %15, %cst_12 {dimension_numbers = #tpu.dot_dimension_numbers<[1], [0], [0], [1], [0, 0, 1, 1], [], []>} : vector<256x128xbf16>, vector<128x128xbf16>, vector<256x128xf32> -> vector<256x128xf32>
    %17 = arith.mulf %16, %14 : vector<256x128xf32>
    %cst_13 = arith.constant dense<0.000000e+00> : vector<256xf32>
    %18 = vector.multi_reduction <add>, %17, %cst_13 [1] : vector<256x128xf32> to vector<256xf32>
    %19 = vector.shape_cast %18 : vector<256xf32> to vector<256x1xf32>
    %cst_14 = arith.constant 0.000000e+00 : f32
    %20 = vector.broadcast %cst_14 : f32 to vector<256x1xf32>
    %21 = arith.subf %20, %19 : vector<256x1xf32>
    %c0_15 = arith.constant 0 : index
    %c0_16 = arith.constant 0 : index
    %22 = vector.load %arg6[%c0_15, %c0_16] : memref<128x128xbf16, #tpu.memory_space<vmem>>, vector<128x128xbf16>
    %23 = arith.extf %22 : vector<128x128xbf16> to vector<128x128xf32>
    %cst_17 = arith.constant dense<0.000000e+00> : vector<256x128xf32>
    %24 = tpu.matmul %14, %23, %cst_17 {dimension_numbers = #tpu.dot_dimension_numbers<[1], [0], [0], [1], [0, 0, 1, 1], [], []>} : vector<256x128xf32>, vector<128x128xf32>, vector<256x128xf32> -> vector<256x128xf32>
    %c0_18 = arith.constant 0 : index
    %c0_19 = arith.constant 0 : index
    %25 = vector.load %arg7[%c0_18, %c0_19] : memref<1x128xf32, #tpu.memory_space<vmem>>, vector<1x128xf32>
    %26 = math.exp %24 : vector<256x128xf32>
    %27 = vector.broadcast %25 : vector<1x128xf32> to vector<256x128xf32>
    %28 = arith.mulf %27, %26 : vector<256x128xf32>
    %cst_20 = arith.constant dense<0.000000e+00> : vector<256xf32>
    %29 = vector.multi_reduction <add>, %28, %cst_20 [1] : vector<256x128xf32> to vector<256xf32>
    %30 = vector.shape_cast %29 : vector<256xf32> to vector<256x1xf32>
    %31 = arith.extf %1 : vector<256x128xbf16> to vector<256x128xf32>
    %cst_21 = arith.constant dense<0.000000e+00> : vector<256xf32>
    %32 = vector.multi_reduction <add>, %31, %cst_21 [1] : vector<256x128xf32> to vector<256xf32>
    %33 = vector.shape_cast %32 : vector<256xf32> to vector<256x1xf32>
    %34 = arith.addf %21, %30 : vector<256x1xf32>
    %35 = arith.mulf %34, %33 : vector<256x1xf32>
    %36 = vector.shape_cast %35 : vector<256x1xf32> to vector<1x256x1xf32>
    %cst_22 = arith.constant dense<0.000000e+00> : vector<1xf32>
    %37 = vector.multi_reduction <add>, %36, %cst_22 [1, 2] : vector<1x256x1xf32> to vector<1xf32>
    %38 = vector.shape_cast %37 : vector<1xf32> to vector<1x1x1xf32>
    %39 = vector.extract %38[0, 0, 0] : f32 from vector<1x1x1xf32>
    %40 = vector.broadcast %39 : f32 to vector<8x128xf32>
    %c0_23 = arith.constant 0 : index
    %c0_24 = arith.constant 0 : index
    %41 = vector.load %arg8[%c0_23, %c0_24] : memref<8x128xf32, #tpu.memory_space<vmem>>, vector<8x128xf32>
    tpu.vector_store %arg8[%c0_23, %c0_24], %40 {strides = array<i32>} : memref<8x128xf32, #tpu.memory_space<vmem>>, vector<8x128xf32>,
    return
  }
  func.func @transform_0(%arg0: i32) -> (i32, i32) {
    %c0_i32 = arith.constant 0 : i32
    %c0_i32_0 = arith.constant 0 : i32
    return %arg0, %c0_i32 : i32, i32
  }
  func.func @transform_1(%arg0: i32) -> (i32, i32) {
    %c0_i32 = arith.constant 0 : i32
    %c0_i32_0 = arith.constant 0 : i32
    return %arg0, %c0_i32 : i32, i32
  }
  func.func @transform_2(%arg0: i32) -> (i32, i32) {
    %c0_i32 = arith.constant 0 : i32
    %c0_i32_0 = arith.constant 0 : i32
    %c0_i32_1 = arith.constant 0 : i32
    return %c0_i32, %c0_i32_0 : i32, i32
  }
  func.func @transform_3(%arg0: i32) -> (i32, i32) {
    %c0_i32 = arith.constant 0 : i32
    %c0_i32_0 = arith.constant 0 : i32
    %c0_i32_1 = arith.constant 0 : i32
    return %c0_i32, %c0_i32_0 : i32, i32
  }
  func.func @transform_4(%arg0: i32) -> (i32, i32) {
    %c0_i32 = arith.constant 0 : i32
    %c0_i32_0 = arith.constant 0 : i32
    %c0_i32_1 = arith.constant 0 : i32
    return %c0_i32, %c0_i32_0 : i32, i32
  }
  func.func @transform_5(%arg0: i32) -> (i32, i32) {
    %c0_i32 = arith.constant 0 : i32
    %c0_i32_0 = arith.constant 0 : i32
    %c0_i32_1 = arith.constant 0 : i32
    return %c0_i32, %c0_i32_0 : i32, i32
  }
  func.func @transform_6(%arg0: i32) -> (i32, i32) {
    %c0_i32 = arith.constant 0 : i32
    %c0_i32_0 = arith.constant 0 : i32
    %c0_i32_1 = arith.constant 0 : i32
    return %c0_i32, %c0_i32_0 : i32, i32
  }
  func.func @transform_7(%arg0: i32) -> (i32, i32) {
    %c0_i32 = arith.constant 0 : i32
    %c0_i32_0 = arith.constant 0 : i32
    return %arg0, %c0_i32 : i32, i32
  }
}

</mosaic_0001>

<bundles_post_ra>
// kernel: tpu_custom_call.1
= control target key start
LH: loop header
LB: loop body
LE: loop exit
PB: predicated region body
PF: predicated region fallthrough
CT: control target
= control target key end

     0   :  { %12 = vsyncpa [#allocation3], 0  ;;  %s3796_s0 = inlined_call_operand.hbm [shape: f32[256,128], index: 0, kind: input, shape index: {}]   ;;  %s3797_s1 = inlined_call_operand.hbm [shape: bf16[256,128], index: 1, kind: input, shape index: {}]   ;;  %s3798_s2 = inlined_call_operand.hbm [shape: bf16[128,128], index: 2, kind: input, shape index: {}]   ;;  %s3799_s3 = inlined_call_operand.hbm [shape: bf16[128,128], index: 3, kind: input, shape index: {}]   ;;  %s3800_s4 = inlined_call_operand.hbm [shape: bf16[128,128], index: 4, kind: input, shape index: {}]   ;;  %s3801_s5 = inlined_call_operand.hbm [shape: bf16[128,128], index: 5, kind: input, shape index: {}]   ;;  %s3802_s6 = inlined_call_operand.vmem [shape: f32[1,128], index: 6, kind: input, shape index: {}]   ;;  %s3803_s7 = inlined_call_operand.hbm [shape: f32[8,128], index: 7, kind: output, shape index: {}]  }
   0x1   :  { %13 = vsyncpa [#allocation6], 0 }
   0x2   :  { %14 = vsyncpa [#allocation9], 0 }
   0x3   :  { %15 = vsyncpa [#allocation12], 0 }
   0x4   :  { %16 = vsyncpa [#allocation4], 0  ;;  %s3143_s24 = smov [#allocation5]   ;;  %s2979_s28 = scalar_lea.hbm %s3797_s1, 2048 }
   0x5   :  { %s34_s25 = sshll.u32 %s3143_s24, 4  ;;  %p2980_p0 = scmp.ne.s32.totalorder %s3797_s1, %s2979_s28  ;;  %s35_s25 = int_to_ptr.vmem [resolvable:$true] %s34_s25 }
   0x6   :  { %p2983_p1 = scmp.lt.u32.totalorder %s2979_s28, %s3797_s1 }
   0x8   :  { %p2985_p2 = pnand %p2983_p1, %p2980_p0 }
   0xa   :  { %2988 = shalt.err (!%p2985_p2)
}
   0xb   :  { %s2989_s10 = scalar_lea.vmem %s35_s25, 2048  ;;  %p2994_p4 = scmp.lt.s32.totalorder %s35_s25, %s35_s25 }
   0xc   :  { %p2990_p3 = scmp.ne.s32.totalorder %s35_s25, %s2989_s10  ;;  %p2995_p5 = scmp.lt.s32.totalorder %s2989_s10, %s2989_s10 }
   0xe   :  { %p2996_p6 = por %p2995_p5, %p2994_p4 }
  0x10   :  { %p2997_p7 = pnand %p2996_p6, %p2990_p3 }
  0x12   :  { %3000 = shalt.err (!%p2997_p7)
}
  0x13   :  { %s3144_s11 = smov 64   ;;  %s3145_s12 = smov 4  }
  0x14   :  { %40 = dma.hbm_to_vmem [thread:$0]  %s3797_s1, 2048, %s35_s25, [#allocation6], %s3144_s11, %s3144_s11, %s3145_s12  }
  0x15   :  { %s3146_s15 = smov [#allocation8]   ;;  %s3147_s17 = smov [#allocation2]  }
  0x16   :  { %s58_s16 = sshll.u32 %s3146_s15, 4  ;;  %s22_s18 = sshll.u32 %s3147_s17, 4  ;;  %s59_s16 = int_to_ptr.vmem [resolvable:$true] %s58_s16  ;;  %s23_s18 = int_to_ptr.vmem [resolvable:$true] %s22_s18 }
  0x17   :  { %s3001_s21 = scalar_lea.hbm %s3799_s3, 1024 }
  0x18   :  { %p3002_p8 = scmp.ne.s32.totalorder %s3799_s3, %s3001_s21  ;;  %p3005_p9 = scmp.lt.u32.totalorder %s3001_s21, %s3799_s3 }
  0x1a   :  { %p3007_p10 = pnand %p3005_p9, %p3002_p8 }
  0x1c   :  { %3010 = shalt.err (!%p3007_p10)
}
  0x1d   :  { %s3011_s1 = scalar_lea.vmem %s59_s16, 1024  ;;  %p3016_p12 = scmp.lt.s32.totalorder %s59_s16, %s59_s16 }
  0x1e   :  { %p3012_p11 = scmp.ne.s32.totalorder %s59_s16, %s3011_s1  ;;  %p3017_p13 = scmp.lt.s32.totalorder %s3011_s1, %s3011_s1 }
  0x20   :  { %p3018_p0 = por %p3017_p13, %p3016_p12 }
  0x22   :  { %p3019_p1 = pnand %p3018_p0, %p3012_p11 }
  0x24   :  { %3022 = shalt.err (!%p3019_p1)
}
  0x25   :  { %64 = dma.hbm_to_vmem [thread:$0]  %s3799_s3, 1024, %s59_s16, [#allocation9], %s3144_s11, %s3144_s11, %s3145_s12  }
  0x26   :  { %s3023_s30 = scalar_lea.hbm %s3796_s0, 4096 }
  0x27   :  { %p3024_p2 = scmp.ne.s32.totalorder %s3796_s0, %s3023_s30  ;;  %p3027_p3 = scmp.lt.u32.totalorder %s3023_s30, %s3796_s0 }
  0x29   :  { %p3029_p4 = pnand %p3027_p3, %p3024_p2 }
  0x2b   :  { %3032 = shalt.err (!%p3029_p4)
}
  0x2c   :  { %s3033_s14 = scalar_lea.vmem %s23_s18, 4096  ;;  %p3038_p6 = scmp.lt.s32.totalorder %s23_s18, %s23_s18 }
  0x2d   :  { %p3034_p5 = scmp.ne.s32.totalorder %s23_s18, %s3033_s14  ;;  %p3039_p7 = scmp.lt.s32.totalorder %s3033_s14, %s3033_s14 }
  0x2f   :  { %p3040_p8 = por %p3039_p7, %p3038_p6 }
  0x31   :  { %p3041_p9 = pnand %p3040_p8, %p3034_p5 }
  0x33   :  { %3044 = shalt.err (!%p3041_p9)
}
  0x34   :  { %s3148_s3 = smov 128   ;;  %s3149_s15 = smov 8  }
  0x35   :  { %28 = dma.hbm_to_vmem [thread:$0]  %s3796_s0, 4096, %s23_s18, [#allocation3], %s3148_s3, %s3148_s3, %s3149_s15  }
  0x36   :  { %s3150_s19 = smov [#allocation7]   ;;  %s3151_s21 = smov [#allocation10]  }
  0x37   :  { %s46_s20 = sshll.u32 %s3150_s19, 4  ;;  %s70_s22 = sshll.u32 %s3151_s21, 4  ;;  %s47_s20 = int_to_ptr.vmem [resolvable:$true] %s46_s20  ;;  %s71_s22 = int_to_ptr.vmem [resolvable:$true] %s70_s22 }
  0x38   :  { %s3045_s26 = scalar_lea.hbm %s3798_s2, 1024 }
  0x39   :  { %p3046_p10 = scmp.ne.s32.totalorder %s3798_s2, %s3045_s26  ;;  %p3049_p11 = scmp.lt.u32.totalorder %s3045_s26, %s3798_s2 }
  0x3b   :  { %p3051_p12 = pnand %p3049_p11, %p3046_p10 }
  0x3d   :  { %3054 = shalt.err (!%p3051_p12)
}
  0x3e   :  { %s3055_s0 = scalar_lea.vmem %s47_s20, 1024  ;;  %p3060_p0 = scmp.lt.s32.totalorder %s47_s20, %s47_s20 }
  0x3f   :  { %p3056_p13 = scmp.ne.s32.totalorder %s47_s20, %s3055_s0  ;;  %p3061_p1 = scmp.lt.s32.totalorder %s3055_s0, %s3055_s0 }
  0x41   :  { %p3062_p2 = por %p3061_p1, %p3060_p0 }
  0x43   :  { %p3063_p3 = pnand %p3062_p2, %p3056_p13 }
  0x45   :  { %3066 = shalt.err (!%p3063_p3)
}
  0x46   :  { %52 = dma.hbm_to_vmem [thread:$0]  %s3798_s2, 1024, %s47_s20, [#allocation6], %s3144_s11, %s3144_s11, %s3145_s12  }
  0x47   :  { %s3067_s9 = scalar_lea.hbm %s3800_s4, 1024 }
  0x48   :  { %p3068_p4 = scmp.ne.s32.totalorder %s3800_s4, %s3067_s9  ;;  %p3071_p5 = scmp.lt.u32.totalorder %s3067_s9, %s3800_s4 }
  0x4a   :  { %p3073_p6 = pnand %p3071_p5, %p3068_p4 }
  0x4c   :  { %3076 = shalt.err (!%p3073_p6)
}
  0x4d   :  { %s3077_s15 = scalar_lea.vmem %s71_s22, 1024  ;;  %p3082_p8 = scmp.lt.s32.totalorder %s71_s22, %s71_s22 }
  0x4e   :  { %p3078_p7 = scmp.ne.s32.totalorder %s71_s22, %s3077_s15  ;;  %p3083_p9 = scmp.lt.s32.totalorder %s3077_s15, %s3077_s15 }
  0x50   :  { %p3084_p10 = por %p3083_p9, %p3082_p8 }
  0x52   :  { %p3085_p11 = pnand %p3084_p10, %p3078_p7 }
  0x54   :  { %3088 = shalt.err (!%p3085_p11)
}
  0x55   :  { %76 = dma.hbm_to_vmem [thread:$0]  %s3800_s4, 1024, %s71_s22, [#allocation9], %s3144_s11, %s3144_s11, %s3145_s12  }
  0x56   :  { %s3152_s17 = smov [#allocation11]   ;;  %s3089_s23 = scalar_lea.hbm %s3801_s5, 1024 }
  0x57   :  { %s82_s19 = sshll.u32 %s3152_s17, 4  ;;  %p3090_p12 = scmp.ne.s32.totalorder %s3801_s5, %s3089_s23  ;;  %s83_s19 = int_to_ptr.vmem [resolvable:$true] %s82_s19 }
  0x58   :  { %p3093_p13 = scmp.lt.u32.totalorder %s3089_s23, %s3801_s5 }
  0x5a   :  { %p3095_p0 = pnand %p3093_p13, %p3090_p12 }
  0x5c   :  { %3098 = shalt.err (!%p3095_p0)
}
  0x5d   :  { %s3099_s27 = scalar_lea.vmem %s83_s19, 1024  ;;  %p3104_p2 = scmp.lt.s32.totalorder %s83_s19, %s83_s19 }
  0x5e   :  { %p3100_p1 = scmp.ne.s32.totalorder %s83_s19, %s3099_s27  ;;  %p3105_p3 = scmp.lt.s32.totalorder %s3099_s27, %s3099_s27 }
  0x60   :  { %p3106_p4 = por %p3105_p3, %p3104_p2 }
  0x62   :  { %p3107_p5 = pnand %p3106_p4, %p3100_p1 }
  0x64   :  { %3110 = shalt.err (!%p3107_p5)
}
  0x65   :  { %88 = dma.hbm_to_vmem [thread:$0]  %s3801_s5, 1024, %s83_s19, [#allocation12], %s3144_s11, %s3144_s11, %s3145_s12  }
  0x66   :  { %3133 = dma.done.wait [#allocation3], 4096  }
  0x67   :  { %3134 = vsyncadd [#allocation3], 4294963200 }
  0x68   :  { %3135 = dma.done.wait [#allocation6], 3072  }
  0x69   :  { %3136 = vsyncadd [#allocation6], 4294964224 }
  0x6a   :  { %3137 = dma.done.wait [#allocation9], 2048  }
  0x6b   :  { %3138 = vsyncadd [#allocation9], 4294965248 }
  0x6c   :  { %3139 = dma.done.wait [#allocation12], 1024  }
  0x6d   :  { %3140 = vsyncadd [#allocation12], 4294966272  ;;  %v2064_v0 = vld [vmem:[#allocation7] sm:$0xff]   ;;  %v2159_v1 = vld [vmem:[#allocation7 + $0x8] sm:$0xff]   ;;  %vm1945_vm0 = vcmask 7168  }
  0x6e   :  { %2637 = vmatprep.subr.bf16.mxu0 %v2064_v0  ;;  %v110_v2 = vld [vmem:[#allocation2] sm:$0xff]  ;;  %v2160_v3 = vld [vmem:[#allocation7 + $0x10] sm:$0xff]   ;;  %v2161_v4 = vld [vmem:[#allocation7 + $0x18] sm:$0xff]  }
  0x6f   :  { %2639 = vmatpush3.bf16.msra.mxu0 %v2064_v0  ;;  %2380 = vmatprep.mubr.f32.mxu0 %v110_v2  ;;  %v2162_v5 = vld [vmem:[#allocation7 + $0x20] sm:$0xff]   ;;  %v2166_v7 = vld [vmem:[#allocation8 + $0x8] sm:$0xff]   ;;  %v2167_v9 = vld [vmem:[#allocation8 + $0x10] sm:$0xff]  }
  0x70   :  { %2641 = vmatprep.subr.bf16.mxu0 %v2159_v1  ;;  %v2096_v6 = vld [vmem:[#allocation8] sm:$0xff]   ;;  %v2163_v8 = vld [vmem:[#allocation7 + $0x28] sm:$0xff]   ;;  %v2164_v10 = vld [vmem:[#allocation7 + $0x30] sm:$0xff]  }
  0x71   :  { %2669 = vmatprep.subr.bf16.mxu1 %v2096_v6  ;;  %v2168_v11 = vld [vmem:[#allocation8 + $0x18] sm:$0xff]   ;;  %v111_v13 = vld [vmem:[#allocation2 + $0x8] sm:$0xff]  ;;  %v112_v14 = vld [vmem:[#allocation2 + $0x10] sm:$0xff] }
  0x72   :  { %2671 = vmatpush3.bf16.msra.mxu1 %v2096_v6  ;;  %v2165_v12 = vld [vmem:[#allocation7 + $0x38] sm:$0xff]   ;;  %v114_v16 = vld [vmem:[#allocation2 + $0x20] sm:$0xff]  ;;  %v115_v17 = vld [vmem:[#allocation2 + $0x28] sm:$0xff] }
  0x73   :  { %2643 = vmatpush3.bf16.msra.mxu0 %v2159_v1  ;;  %2673 = vmatprep.subr.bf16.mxu1 %v2166_v7  ;;  %v113_v15 = vld [vmem:[#allocation2 + $0x18] sm:$0xff]  ;;  %v116_v18 = vld [vmem:[#allocation2 + $0x30] sm:$0xff]  ;;  %v118_v20 = vld [vmem:[#allocation2 + $0x40] sm:$0xff] }
  0x74   :  { %2645 = vmatprep.subr.bf16.mxu0 %v2160_v3  ;;  %v117_v19 = vld [vmem:[#allocation2 + $0x38] sm:$0xff]  ;;  %v119_v21 = vld [vmem:[#allocation2 + $0x48] sm:$0xff]  ;;  %v120_v22 = vld [vmem:[#allocation2 + $0x50] sm:$0xff] }
  0x75   :  { %v121_v23 = vld [vmem:[#allocation2 + $0x58] sm:$0xff]  ;;  %v122_v24 = vld [vmem:[#allocation2 + $0x60] sm:$0xff]  ;;  %v123_v25 = vld [vmem:[#allocation2 + $0x68] sm:$0xff] }
  0x76   :  { %2675 = vmatpush3.bf16.msra.mxu1 %v2166_v7  ;;  %v124_v26 = vld [vmem:[#allocation2 + $0x70] sm:$0xff]  ;;  %v125_v27 = vld [vmem:[#allocation2 + $0x78] sm:$0xff]  ;;  %v126_v28 = vld [vmem:[#allocation2 + $0x80] sm:$0xff] }
  0x77   :  { %2647 = vmatpush3.bf16.msra.mxu0 %v2160_v3  ;;  %2677 = vmatprep.subr.bf16.mxu1 %v2167_v9  ;;  %v127_v29 = vld [vmem:[#allocation2 + $0x88] sm:$0xff]  ;;  %v128_v30 = vld [vmem:[#allocation2 + $0x90] sm:$0xff]  ;;  %v129_v31 = vld [vmem:[#allocation2 + $0x98] sm:$0xff] }
  0x78   :  { %2649 = vmatprep.subr.bf16.mxu0 %v2161_v4  ;;  %v130_v32 = vld [vmem:[#allocation2 + $0xa0] sm:$0xff]  ;;  %v131_v33 = vld [vmem:[#allocation2 + $0xa8] sm:$0xff]  ;;  %v132_v34 = vld [vmem:[#allocation2 + $0xb0] sm:$0xff] }
  0x79   :  { %v133_v35 = vld [vmem:[#allocation2 + $0xb8] sm:$0xff]  ;;  %v134_v36 = vld [vmem:[#allocation2 + $0xc0] sm:$0xff]  ;;  %v135_v37 = vld [vmem:[#allocation2 + $0xc8] sm:$0xff] }
  0x7a   :  { %2679 = vmatpush3.bf16.msra.mxu1 %v2167_v9  ;;  %v136_v38 = vld [vmem:[#allocation2 + $0xd0] sm:$0xff]  ;;  %v137_v39 = vld [vmem:[#allocation2 + $0xd8] sm:$0xff]  ;;  %v138_v40 = vld [vmem:[#allocation2 + $0xe0] sm:$0xff] }
  0x7b   :  { %2651 = vmatpush3.bf16.msra.mxu0 %v2161_v4  ;;  %2681 = vmatprep.subr.bf16.mxu1 %v2168_v11  ;;  %v139_v41 = vld [vmem:[#allocation2 + $0xe8] sm:$0xff]  ;;  %v140_v42 = vld [vmem:[#allocation2 + $0xf0] sm:$0xff]  ;;  %v141_v43 = vld [vmem:[#allocation2 + $0xf8] sm:$0xff] }
  0x7c   :  { %2653 = vmatprep.subr.bf16.mxu0 %v2162_v5  ;;  %v2745_v44 = vld [vmem:[#allocation10] sm:$0xff]   ;;  %v2746_v46 = vld [vmem:[#allocation10 + $0x8] sm:$0xff]   ;;  %v2747_v48 = vld [vmem:[#allocation10 + $0x10] sm:$0xff]  }
  0x7d   :  { %v2169_v45 = vld [vmem:[#allocation8 + $0x20] sm:$0xff]   ;;  %v2170_v47 = vld [vmem:[#allocation8 + $0x28] sm:$0xff]   ;;  %v2171_v49 = vld [vmem:[#allocation8 + $0x30] sm:$0xff]  }
  0x7e   :  { %2683 = vmatpush3.bf16.msra.mxu1 %v2168_v11  ;;  %v2748_v50 = vld [vmem:[#allocation10 + $0x18] sm:$0xff]   ;;  %v2749_v52 = vld [vmem:[#allocation10 + $0x20] sm:$0xff]   ;;  %v2750_v53 = vld [vmem:[#allocation10 + $0x28] sm:$0xff]  }
  0x7f   :  { %2655 = vmatpush3.bf16.msra.mxu0 %v2162_v5  ;;  %2685 = vmatprep.subr.bf16.mxu1 %v2169_v45  ;;  %v2172_v51 = vld [vmem:[#allocation8 + $0x38] sm:$0xff]   ;;  %v2751_v54 = vld [vmem:[#allocation10 + $0x30] sm:$0xff]   ;;  %v142_v56 = vld [vmem:[#allocation5] sm:$0xff]  }
  0x80   :  { %2657 = vmatprep.subr.bf16.mxu0 %v2163_v8  ;;  %v2752_v55 = vld [vmem:[#allocation10 + $0x38] sm:$0xff]   ;;  %v144_v57 = vld [vmem:[#allocation5 + $0x8] sm:$0xff]   ;;  %v146_v58 = vld [vmem:[#allocation5 + $0x10] sm:$0xff]   ;;  %v1786_v7 = vunpack.c.h.bf16 %v142_v56 }
  0x81   :  { %v148_v59 = vld [vmem:[#allocation5 + $0x18] sm:$0xff]   ;;  %v150_v60 = vld [vmem:[#allocation5 + $0x20] sm:$0xff]   ;;  %v152_v61 = vld [vmem:[#allocation5 + $0x28] sm:$0xff]   ;;  %v1787_v11 = vunpack.c.l.bf16 %v144_v57 }
  0x82   :  { %2687 = vmatpush3.bf16.msra.mxu1 %v2169_v45  ;;  %v154_v62 = vld [vmem:[#allocation5 + $0x30] sm:$0xff]   ;;  %v156_v63 = vld [vmem:[#allocation5 + $0x38] sm:$0xff]   ;;  %v158_v0 = vld [vmem:[#allocation5 + $0x40] sm:$0xff]   ;;  %1819 = vadd.xlane.f32.xlu0 %v1786_v7 }
  0x83   :  { %2659 = vmatpush3.bf16.msra.mxu0 %v2163_v8  ;;  %2689 = vmatprep.subr.bf16.mxu1 %v2170_v47  ;;  %v3281_v1 = vld [vmem:[#allocation5 + $0x48] sm:$0xff]   ;;  %v3284_v2 = vld [vmem:[#allocation5 + $0x50] sm:$0xff]   ;;  %v3286_v3 = vld [vmem:[#allocation5 + $0x58] sm:$0xff]   ;;  %v1785_v8 = vunpack.c.l.bf16 %v142_v56 }
  0x84   :  { %2661 = vmatprep.subr.bf16.mxu0 %v2164_v10  ;;  %v3290_v4 = vld [vmem:[#allocation5 + $0x60] sm:$0xff]   ;;  %v3292_v5 = vld [vmem:[#allocation5 + $0x68] sm:$0xff]   ;;  %v3294_v6 = vld [vmem:[#allocation5 + $0x70] sm:$0xff]  }
  0x85   :  { %v3296_v9 = vld [vmem:[#allocation11] sm:$0xff]   ;;  %1817 = vadd.xlane.f32.xlu1 %v1785_v8  ;;  %v2173_v45 = vld [vmem:[#allocation11 + $0x8] sm:$0xff]  }
  0x86   :  { %2691 = vmatpush3.bf16.msra.mxu1 %v2170_v47  ;;  %v2176_v8 = vld [vmem:[#allocation11 + $0x20] sm:$0xff]  }
  0x87   :  { %2663 = vmatpush3.bf16.msra.mxu0 %v2164_v10  ;;  %2693 = vmatprep.subr.bf16.mxu1 %v2171_v49  ;;  %v1788_v10 = vunpack.c.h.bf16 %v144_v57 }
  0x88   :  { %2665 = vmatprep.subr.bf16.mxu0 %v2165_v12 }
  0x89   :  { %1823 = vadd.xlane.f32.xlu0 %v1788_v10  ;;  %1821 = vadd.xlane.f32.xlu1 %v1787_v11 }
  0x8a   :  { %2695 = vmatpush3.bf16.msra.mxu1 %v2171_v49 }
  0x8b   :  { %2667 = vmatpush3.bf16.msra.mxu0 %v2165_v12  ;;  %2697 = vmatprep.subr.bf16.mxu1 %v2172_v51  ;;  %v172_v12 = vld [vmem:[#allocation5 + $0x78] sm:$0xff]  }
  0x8c   :  { %2508 = vmatprep.subr.bf16.mxu0 %v2745_v44 }
  0x8e   :  { %2381 = vmatmul.mubr.f32.vlgmr.msra.gmra.mrb[0].mxu0 %v111_v13  ;;  %2699 = vmatpush3.bf16.msra.mxu1 %v2172_v51  ;;  %v1790_v13 = vunpack.c.h.bf16 %v146_v58 }
  0x8f   :  { %2383 = vmatprep.mubr.f32.mxu0 %v112_v14  ;;  %2509 = vmatpush3.bf16.msra.mxu0 %v2745_v44  ;;  %v1789_v14 = vunpack.c.l.bf16 %v146_v58 }
  0x90   :  { %2510 = vmatprep.subr.bf16.mxu0 %v2746_v46  ;;  %2701 = vmatprep.subr.bf16.mxu1 %v3296_v9 }
  0x91   :  { %1827 = vadd.xlane.f32.xlu0 %v1790_v13  ;;  %1825 = vadd.xlane.f32.xlu1 %v1789_v14 }
  0x92   :  { %2384 = vmatmul.mubr.f32.gmra.mrb[2].mxu0 %v113_v15  ;;  %v1792_v15 = vunpack.c.h.bf16 %v148_v59 }
  0x93   :  { %2386 = vmatprep.mubr.f32.mxu0 %v114_v16  ;;  %2511 = vmatpush3.bf16.msra.mxu0 %v2746_v46  ;;  %v1791_v16 = vunpack.c.l.bf16 %v148_v59 }
  0x94   :  { %2512 = vmatprep.subr.bf16.mxu0 %v2747_v48 }
  0x95   :  { %1831 = vadd.xlane.f32.xlu0 %v1792_v15  ;;  %1829 = vadd.xlane.f32.xlu1 %v1791_v16  ;;  %v2177_v15 = vld [vmem:[#allocation11 + $0x28] sm:$0xff]  }
  0x96   :  { %2387 = vmatmul.mubr.f32.gmra.mrb[4].mxu0 %v115_v17  ;;  %v1794_v17 = vunpack.c.h.bf16 %v150_v60 }
  0x97   :  { %2389 = vmatprep.mubr.f32.mxu0 %v116_v18  ;;  %2513 = vmatpush3.bf16.msra.mxu0 %v2747_v48  ;;  %v1793_v18 = vunpack.c.l.bf16 %v150_v60 }
  0x98   :  { %2514 = vmatprep.subr.bf16.mxu0 %v2748_v50 }
  0x99   :  { %1835 = vadd.xlane.f32.xlu0 %v1794_v17  ;;  %1833 = vadd.xlane.f32.xlu1 %v1793_v18 }
  0x9a   :  { %2390 = vmatmul.mubr.f32.gmra.mrb[6].mxu0 %v117_v19  ;;  %v1796_v19 = vunpack.c.h.bf16 %v152_v61 }
  0x9b   :  { %2392 = vmatprep.mubr.f32.mxu0 %v118_v20  ;;  %2515 = vmatpush3.bf16.msra.mxu0 %v2748_v50  ;;  %v1795_v20 = vunpack.c.l.bf16 %v152_v61 }
  0x9c   :  { %2516 = vmatprep.subr.bf16.mxu0 %v2749_v52 }
  0x9d   :  { %1839 = vadd.xlane.f32.xlu0 %v1796_v19  ;;  %1837 = vadd.xlane.f32.xlu1 %v1795_v20 }
  0x9e   :  { %2393 = vmatmul.mubr.f32.gmra.mrb[8].mxu0 %v119_v21  ;;  %v1798_v21 = vunpack.c.h.bf16 %v154_v62 }
  0x9f   :  { %2395 = vmatprep.mubr.f32.mxu0 %v120_v22  ;;  %2517 = vmatpush3.bf16.msra.mxu0 %v2749_v52  ;;  %v1797_v22 = vunpack.c.l.bf16 %v154_v62  ;;  %v2174_v52 = vld [vmem:[#allocation11 + $0x10] sm:$0xff]  }
  0xa0   :  { %2518 = vmatprep.subr.bf16.mxu0 %v2750_v53 }
  0xa1   :  { %1843 = vadd.xlane.f32.xlu0 %v1798_v21  ;;  %1841 = vadd.xlane.f32.xlu1 %v1797_v22 }
  0xa2   :  { %2396 = vmatmul.mubr.f32.gmra.mrb[10].mxu0 %v121_v23  ;;  %v1800_v23 = vunpack.c.h.bf16 %v156_v63 }
  0xa3   :  { %2398 = vmatprep.mubr.f32.mxu0 %v122_v24  ;;  %2519 = vmatpush3.bf16.msra.mxu0 %v2750_v53  ;;  %v1799_v24 = vunpack.c.l.bf16 %v156_v63 }
  0xa4   :  { %2520 = vmatprep.subr.bf16.mxu0 %v2751_v54 }
  0xa5   :  { %1847 = vadd.xlane.f32.xlu0 %v1800_v23  ;;  %1845 = vadd.xlane.f32.xlu1 %v1799_v24 }
  0xa6   :  { %2399 = vmatmul.mubr.f32.gmra.mrb[12].mxu0 %v123_v25  ;;  %v1802_v25 = vunpack.c.h.bf16 %v158_v0 }
  0xa7   :  { %2401 = vmatprep.mubr.f32.mxu0 %v124_v26  ;;  %2521 = vmatpush3.bf16.msra.mxu0 %v2751_v54  ;;  %v1801_v26 = vunpack.c.l.bf16 %v158_v0 }
  0xa8   :  { %2522 = vmatprep.subr.bf16.mxu0 %v2752_v55 }
  0xa9   :  { %1851 = vadd.xlane.f32.xlu0 %v1802_v25  ;;  %1849 = vadd.xlane.f32.xlu1 %v1801_v26 }
  0xaa   :  { %2402 = vmatmul.mubr.f32.gmra.mrb[14].mxu0 %v125_v27 }
  0xab   :  { %2404 = vmatprep.mubr.f32.mxu0 %v126_v28  ;;  %2523 = vmatpush3.bf16.msra.mxu0 %v2752_v55 }
  0xae   :  { %2405 = vmatmul.mubr.f32.gmra.mrb[16].mxu0 %v127_v29 }
  0xaf   :  { %2407 = vmatprep.mubr.f32.mxu0 %v128_v30 }
  0xb2   :  { %2408 = vmatmul.mubr.f32.gmra.mrb[18].mxu0 %v129_v31 }
  0xb3   :  { %2410 = vmatprep.mubr.f32.mxu0 %v130_v32 }
  0xb6   :  { %2411 = vmatmul.mubr.f32.gmra.mrb[20].mxu0 %v131_v33 }
  0xb7   :  { %2413 = vmatprep.mubr.f32.mxu0 %v132_v34 }
  0xba   :  { %2414 = vmatmul.mubr.f32.gmra.mrb[22].mxu0 %v133_v35 }
  0xbb   :  { %2416 = vmatprep.mubr.f32.mxu0 %v134_v36 }
  0xbe   :  { %2417 = vmatmul.mubr.f32.gmra.mrb[24].mxu0 %v135_v37 }
  0xbf   :  { %2419 = vmatprep.mubr.f32.mxu0 %v136_v38 }
  0xc2   :  { %2420 = vmatmul.mubr.f32.gmra.mrb[26].mxu0 %v137_v39 }
  0xc3   :  { %2422 = vmatprep.mubr.f32.mxu0 %v138_v40 }
  0xc6   :  { %2423 = vmatmul.mubr.f32.gmra.mrb[28].mxu0 %v139_v41 }
  0xc7   :  { %2425 = vmatprep.mubr.f32.mxu0 %v140_v42 }
  0xca   :  { %2426 = vmatmul.mubr.f32.gmra.mrb[30].mxu0 %v141_v43 }
  0xcb   :  { %2524 = vmatprep.mubr.bf16.mxu0 %v142_v56 }
  0xce   :  { %2525 = vmatmul.mubr.bf16.vlgmr.msra.gmra.mrb[32].mxu0 %v144_v57 }
  0xcf   :  { %2528 = vmatprep.mubr.bf16.mxu0 %v146_v58 }
  0xd6   :  { %2529 = vmatmul.mubr.bf16.gmra.mrb[36].mxu0 %v148_v59  ;;  %v2175_v59 = vld [vmem:[#allocation11 + $0x18] sm:$0xff]  }
  0xd7   :  { %2532 = vmatprep.mubr.bf16.mxu0 %v150_v60 }
  0xde   :  { %2533 = vmatmul.mubr.bf16.gmra.mrb[40].mxu0 %v152_v61 }
  0xdf   :  { %2536 = vmatprep.mubr.bf16.mxu0 %v154_v62 }
  0xe6   :  { %2537 = vmatmul.mubr.bf16.gmra.mrb[44].mxu0 %v156_v63 }
  0xe7   :  { %2540 = vmatprep.mubr.bf16.mxu0 %v158_v0 }
  0xee   :  { %2541 = vmatmul.mubr.bf16.gmra.mrb[48].mxu0 %v3281_v1 }
  0xef   :  { %2544 = vmatprep.mubr.bf16.mxu0 %v3284_v2 }
  0xf6   :  { %2545 = vmatmul.mubr.bf16.gmra.mrb[52].mxu0 %v3286_v3 }
  0xf7   :  { %2548 = vmatprep.mubr.bf16.mxu0 %v3290_v4 }
  0xfe   :  { %2549 = vmatmul.mubr.bf16.gmra.mrb[56].mxu0 %v3292_v5 }
  0xff   :  { %2552 = vmatprep.mubr.bf16.mxu0 %v3294_v6 }
 0x106   :  { %2553 = vmatmul.mubr.bf16.gmra.mrb[60].mxu0 %v172_v12 }
 0x161   :  { %v3302_v27 = vpop.f32.mrb[0].mxu0 }
 0x162   :  { %v433_v28 = vmul.f32 1.442695, %v3302_v27  ;;  %v3305_v29 = vpop.f32.mrb[1].mxu0 }
 0x163   :  { %v431_v30 = vmul.f32 1.442695, %v3305_v29 }
 0x165   :  { %v3308_v31 = vpop.f32.mrb[2].mxu0  ;;  %2785 = vpow2.f32 %v431_v30 }
 0x166   :  { %2787 = vpow2.f32 %v433_v28  ;;  %v437_v32 = vmul.f32 1.442695, %v3308_v31  ;;  %v3311_v33 = vpop.f32.mrb[3].mxu0 }
 0x167   :  { %v435_v34 = vmul.f32 1.442695, %v3311_v33 }
 0x169   :  { %2789 = vpow2.f32 %v435_v34  ;;  %v3314_v35 = vpop.f32.mrb[4].mxu0 }
 0x16a   :  { %2791 = vpow2.f32 %v437_v32  ;;  %v441_v36 = vmul.f32 1.442695, %v3314_v35  ;;  %v3317_v37 = vpop.f32.mrb[5].mxu0 }
 0x16b   :  { %v439_v38 = vmul.f32 1.442695, %v3317_v37 }
 0x16c   :  { %2793 = vpow2.f32 %v441_v36 }
 0x16d   :  { %2795 = vpow2.f32 %v439_v38  ;;  %v3320_v39 = vpop.f32.mrb[6].mxu0 }
 0x16e   :  { %v445_v40 = vmul.f32 1.442695, %v3320_v39  ;;  %v3323_v41 = vpop.f32.mrb[7].mxu0 }
 0x16f   :  { %v2786_v42 = vpop.eup %2785  ;;  %v443_v43 = vmul.f32 1.442695, %v3323_v41 }
 0x170   :  { %v2788_v44 = vpop.eup %2787  ;;  %2797 = vpow2.f32 %v445_v40  ;;  %2460 = vmatprep.mubr.f32.mxu1 %v2786_v42 }
 0x171   :  { %2799 = vpow2.f32 %v443_v43  ;;  %v3326_v46 = vpop.f32.mrb[8].mxu0  ;;  %2461 = vmatmul.mubr.f32.vlgmr.msra.gmra.mrb[0].mxu1 %v2788_v44 }
 0x172   :  { %v449_v47 = vmul.f32 1.442695, %v3326_v46  ;;  %v3329_v48 = vpop.f32.mrb[9].mxu0  ;;  %2703 = vmatpush3.bf16.msra.mxu1 %v3296_v9 }
 0x173   :  { %v2790_v49 = vpop.eup %2789  ;;  %v447_v50 = vmul.f32 1.442695, %v3329_v48  ;;  %2705 = vmatprep.subr.bf16.mxu1 %v2173_v45 }
 0x174   :  { %v2792_v51 = vpop.eup %2791  ;;  %2801 = vpow2.f32 %v449_v47  ;;  %2463 = vmatprep.mubr.f32.mxu1 %v2790_v49 }
 0x175   :  { %2803 = vpow2.f32 %v447_v50  ;;  %v3333_v53 = vpop.f32.mrb[10].mxu0  ;;  %2464 = vmatmul.mubr.f32.gmra.mrb[2].mxu1 %v2792_v51 }
 0x176   :  { %v2794_v54 = vpop.eup %2793  ;;  %v453_v55 = vmul.f32 1.442695, %v3333_v53  ;;  %v3336_v56 = vpop.f32.mrb[11].mxu0  ;;  %2707 = vmatpush3.bf16.msra.mxu1 %v2173_v45 }
 0x177   :  { %v2796_v57 = vpop.eup %2795  ;;  %v451_v58 = vmul.f32 1.442695, %v3336_v56  ;;  %2709 = vmatprep.subr.bf16.mxu1 %v2174_v52 }
 0x178   :  { %2805 = vpow2.f32 %v453_v55  ;;  %2466 = vmatprep.mubr.f32.mxu1 %v2796_v57 }
 0x179   :  { %2807 = vpow2.f32 %v451_v58  ;;  %v3339_v60 = vpop.f32.mrb[12].mxu0  ;;  %2467 = vmatmul.mubr.f32.gmra.mrb[4].mxu1 %v2794_v54 }
 0x17a   :  { %v2798_v61 = vpop.eup %2797  ;;  %v457_v62 = vmul.f32 1.442695, %v3339_v60  ;;  %v3342_v63 = vpop.f32.mrb[13].mxu0  ;;  %2711 = vmatpush3.bf16.msra.mxu1 %v2174_v52 }
 0x17b   :  { %v2800_v0 = vpop.eup %2799  ;;  %v455_v7 = vmul.f32 1.442695, %v3342_v63  ;;  %2713 = vmatprep.subr.bf16.mxu1 %v2175_v59 }
 0x17c   :  { %2809 = vpow2.f32 %v457_v62  ;;  %2469 = vmatprep.mubr.f32.mxu1 %v2800_v0 }
 0x17d   :  { %2811 = vpow2.f32 %v455_v7  ;;  %v3345_v9 = vpop.f32.mrb[14].mxu0  ;;  %2470 = vmatmul.mubr.f32.gmra.mrb[6].mxu1 %v2798_v61 }
 0x17e   :  { %v2802_v10 = vpop.eup %2801  ;;  %v461_v11 = vmul.f32 1.442695, %v3345_v9  ;;  %v3348_v12 = vpop.f32.mrb[15].mxu0  ;;  %2715 = vmatpush3.bf16.msra.mxu1 %v2175_v59 }
 0x17f   :  { %v2804_v13 = vpop.eup %2803  ;;  %v459_v14 = vmul.f32 1.442695, %v3348_v12  ;;  %2717 = vmatprep.subr.bf16.mxu1 %v2176_v8 }
 0x180   :  { %2813 = vpow2.f32 %v461_v11  ;;  %2472 = vmatprep.mubr.f32.mxu1 %v2804_v13 }
 0x181   :  { %2815 = vpow2.f32 %v459_v14  ;;  %v3351_v16 = vpop.f32.mrb[16].mxu0  ;;  %2473 = vmatmul.mubr.f32.gmra.mrb[8].mxu1 %v2802_v10 }
 0x182   :  { %v2806_v17 = vpop.eup %2805  ;;  %v465_v18 = vmul.f32 1.442695, %v3351_v16  ;;  %v3354_v19 = vpop.f32.mrb[17].mxu0  ;;  %2719 = vmatpush3.bf16.msra.mxu1 %v2176_v8 }
 0x183   :  { %v2808_v20 = vpop.eup %2807  ;;  %v463_v21 = vmul.f32 1.442695, %v3354_v19  ;;  %2721 = vmatprep.subr.bf16.mxu1 %v2177_v15 }
 0x184   :  { %2817 = vpow2.f32 %v465_v18  ;;  %2475 = vmatprep.mubr.f32.mxu1 %v2808_v20 }
 0x185   :  { %2819 = vpow2.f32 %v463_v21  ;;  %v3357_v22 = vpop.f32.mrb[18].mxu0  ;;  %2476 = vmatmul.mubr.f32.gmra.mrb[10].mxu1 %v2806_v17 }
 0x186   :  { %v2810_v23 = vpop.eup %2809  ;;  %v469_v24 = vmul.f32 1.442695, %v3357_v22  ;;  %v3360_v25 = vpop.f32.mrb[19].mxu0  ;;  %2723 = vmatpush3.bf16.msra.mxu1 %v2177_v15 }
 0x187   :  { %v2812_v26 = vpop.eup %2811  ;;  %v467_v28 = vmul.f32 1.442695, %v3360_v25 }
 0x188   :  { %2821 = vpow2.f32 %v469_v24  ;;  %2478 = vmatprep.mubr.f32.mxu1 %v2812_v26 }
 0x189   :  { %2823 = vpow2.f32 %v467_v28  ;;  %v3363_v30 = vpop.f32.mrb[20].mxu0  ;;  %2479 = vmatmul.mubr.f32.gmra.mrb[12].mxu1 %v2810_v23 }
 0x18a   :  { %v2814_v32 = vpop.eup %2813  ;;  %v473_v34 = vmul.f32 1.442695, %v3363_v30  ;;  %v3366_v36 = vpop.f32.mrb[21].mxu0 }
 0x18b   :  { %v2816_v38 = vpop.eup %2815  ;;  %v471_v40 = vmul.f32 1.442695, %v3366_v36 }
 0x18c   :  { %2825 = vpow2.f32 %v473_v34  ;;  %2481 = vmatprep.mubr.f32.mxu1 %v2816_v38 }
 0x18d   :  { %2827 = vpow2.f32 %v471_v40  ;;  %v3369_v42 = vpop.f32.mrb[22].mxu0  ;;  %2482 = vmatmul.mubr.f32.gmra.mrb[14].mxu1 %v2814_v32 }
 0x18e   :  { %v2818_v43 = vpop.eup %2817  ;;  %v477_v44 = vmul.f32 1.442695, %v3369_v42  ;;  %v3372_v45 = vpop.f32.mrb[23].mxu0 }
 0x18f   :  { %v2820_v47 = vpop.eup %2819  ;;  %v475_v49 = vmul.f32 1.442695, %v3372_v45 }
 0x190   :  { %2829 = vpow2.f32 %v477_v44  ;;  %2484 = vmatprep.mubr.f32.mxu1 %v2820_v47  ;;  %v1803_v44 = vunpack.c.l.bf16 %v3281_v1  ;;  %v1806_v47 = vunpack.c.h.bf16 %v3284_v2 }
 0x191   :  { %2831 = vpow2.f32 %v475_v49  ;;  %v3375_v50 = vpop.f32.mrb[24].mxu0  ;;  %2485 = vmatmul.mubr.f32.gmra.mrb[16].mxu1 %v2818_v43  ;;  %v1804_v43 = vunpack.c.h.bf16 %v3281_v1  ;;  %v1805_v49 = vunpack.c.l.bf16 %v3284_v2  ;;  %v1812_v2 = vunpack.c.h.bf16 %v3292_v5 }
 0x192   :  { %3812 = vst [vmem:[#allocation19_spill] sm:$0xff] %v3375_v50  ;;  %v2822_v51 = vpop.eup %2821  ;;  %v481_v52 = vmul.f32 1.442695, %v3375_v50  ;;  %v3378_v54 = vpop.f32.mrb[25].mxu0  ;;  %1853 = vadd.xlane.f32.xlu1 %v1803_v44 }
 0x193   :  { %3813 = vst [vmem:[#allocation20_spill] sm:$0xff] %v3378_v54  ;;  %v2824_v55 = vpop.eup %2823  ;;  %v479_v57 = vmul.f32 1.442695, %v3378_v54  ;;  %1855 = vadd.xlane.f32.xlu0 %v1804_v43 }
 0x194   :  { %2833 = vpow2.f32 %v481_v52  ;;  %2487 = vmatprep.mubr.f32.mxu1 %v2824_v55  ;;  %v1807_v52 = vunpack.c.l.bf16 %v3286_v3  ;;  %v1810_v55 = vunpack.c.h.bf16 %v3290_v4 }
 0x195   :  { %2835 = vpow2.f32 %v479_v57  ;;  %v3381_v58 = vpop.f32.mrb[26].mxu0  ;;  %2488 = vmatmul.mubr.f32.gmra.mrb[18].mxu1 %v2822_v51  ;;  %v1808_v51 = vunpack.c.h.bf16 %v3286_v3  ;;  %v1809_v57 = vunpack.c.l.bf16 %v3290_v4 }
 0x196   :  { %3814 = vst [vmem:[#allocation21_spill] sm:$0xff] %v3381_v58  ;;  %v2826_v59 = vpop.eup %2825  ;;  %v485_v61 = vmul.f32 1.442695, %v3381_v58  ;;  %v3384_v62 = vpop.f32.mrb[27].mxu0  ;;  %1857 = vadd.xlane.f32.xlu1 %v1805_v49 }
 0x197   :  { %3815 = vst [vmem:[#allocation22_spill] sm:$0xff] %v3384_v62  ;;  %v2828_v0 = vpop.eup %2827  ;;  %v483_v7 = vmul.f32 1.442695, %v3384_v62  ;;  %1859 = vadd.xlane.f32.xlu0 %v1806_v47 }
 0x198   :  { %2837 = vpow2.f32 %v485_v61  ;;  %2490 = vmatprep.mubr.f32.mxu1 %v2828_v0  ;;  %v1811_v61 = vunpack.c.l.bf16 %v3292_v5  ;;  %v2179_v0 = vld [vmem:[#allocation11 + $0x38] sm:$0xff]  }
 0x199   :  { %2839 = vpow2.f32 %v483_v7  ;;  %v3387_v8 = vpop.f32.mrb[28].mxu0  ;;  %2491 = vmatmul.mubr.f32.gmra.mrb[20].mxu1 %v2826_v59  ;;  %v2178_v59 = vld [vmem:[#allocation11 + $0x30] sm:$0xff]  }
 0x19a   :  { %3816 = vst [vmem:[#allocation23_spill] sm:$0xff] %v3387_v8  ;;  %v2830_v10 = vpop.eup %2829  ;;  %v489_v11 = vmul.f32 1.442695, %v3387_v8  ;;  %v3390_v13 = vpop.f32.mrb[29].mxu0  ;;  %1861 = vadd.xlane.f32.xlu1 %v1807_v52  ;;  %2725 = vmatprep.subr.bf16.mxu1 %v2178_v59 }
 0x19b   :  { %3817 = vst [vmem:[#allocation24_spill] sm:$0xff] %v3390_v13  ;;  %v2832_v14 = vpop.eup %2831  ;;  %v487_v15 = vmul.f32 1.442695, %v3390_v13  ;;  %1863 = vadd.xlane.f32.xlu0 %v1808_v51  ;;  %2727 = vmatpush3.bf16.msra.mxu1 %v2178_v59 }
 0x19c   :  { %2841 = vpow2.f32 %v489_v11  ;;  %2493 = vmatprep.mubr.f32.mxu1 %v2832_v14  ;;  %2729 = vmatprep.subr.bf16.mxu1 %v2179_v0 }
 0x19d   :  { %2843 = vpow2.f32 %v487_v15  ;;  %v3393_v17 = vpop.f32.mrb[30].mxu0  ;;  %2494 = vmatmul.mubr.f32.gmra.mrb[22].mxu1 %v2830_v10  ;;  %v1813_v10 = vunpack.c.l.bf16 %v3294_v6 }
 0x19e   :  { %3818 = vst [vmem:[#allocation25_spill] sm:$0xff] %v3393_v17  ;;  %v2834_v18 = vpop.eup %2833  ;;  %v493_v20 = vmul.f32 1.442695, %v3393_v17  ;;  %v3396_v21 = vpop.f32.mrb[31].mxu0  ;;  %1865 = vadd.xlane.f32.xlu1 %v1809_v57 }
 0x19f   :  { %3819 = vst [vmem:[#allocation26_spill] sm:$0xff] %v3396_v21  ;;  %v2836_v23 = vpop.eup %2835  ;;  %v491_v24 = vmul.f32 1.442695, %v3396_v21  ;;  %1867 = vadd.xlane.f32.xlu0 %v1810_v55  ;;  %2731 = vmatpush3.bf16.msra.mxu1 %v2179_v0 }
 0x1a0   :  { %2845 = vpow2.f32 %v493_v20  ;;  %2496 = vmatprep.mubr.f32.mxu1 %v2836_v23 }
 0x1a1   :  { %2847 = vpow2.f32 %v491_v24  ;;  %2497 = vmatmul.mubr.f32.gmra.mrb[24].mxu1 %v2834_v18  ;;  %v3407_v1 = vpop.f32.mrb[32].mxu0 }
 0x1a2   :  { %v2838_v26 = vpop.eup %2837  ;;  %v3411_v7 = vpop.f32.mrb[33].mxu0  ;;  %1869 = vadd.xlane.f32.xlu1 %v1811_v61 }
 0x1a3   :  { %v2840_v28 = vpop.eup %2839  ;;  %1871 = vadd.xlane.f32.xlu0 %v1812_v2  ;;  %v3413_v3 = vpop.f32.mrb[34].mxu0 }
 0x1a4   :  { %2499 = vmatprep.mubr.f32.mxu1 %v2840_v28  ;;  %v3415_v4 = vpop.f32.mrb[35].mxu0 }
 0x1a5   :  { %2500 = vmatmul.mubr.f32.gmra.mrb[26].mxu1 %v2838_v26 }
 0x1a6   :  { %v2842_v32 = vpop.eup %2841  ;;  %1873 = vadd.xlane.f32.xlu1 %v1813_v10 }
 0x1a7   :  { %v2844_v34 = vpop.eup %2843 }
 0x1a8   :  { %2502 = vmatprep.mubr.f32.mxu1 %v2844_v34 }
 0x1a9   :  { %2503 = vmatmul.mubr.f32.gmra.mrb[28].mxu1 %v2842_v32  ;;  %v3418_v11 = vpop.f32.mrb[36].mxu0 }
 0x1aa   :  { %v2846_v38 = vpop.eup %2845  ;;  %v3420_v14 = vpop.f32.mrb[37].mxu0 }
 0x1ab   :  { %v2848_v40 = vpop.eup %2847  ;;  %v3422_v15 = vpop.f32.mrb[38].mxu0 }
 0x1ac   :  { %2505 = vmatprep.mubr.f32.mxu1 %v2848_v40  ;;  %v3424_v5 = vpop.f32.mrb[39].mxu0 }
 0x1ad   :  { %2506 = vmatmul.mubr.f32.gmra.mrb[30].mxu1 %v2846_v38 }
 0x1b1   :  { %v3426_v18 = vpop.f32.mrb[40].mxu0 }
 0x1b2   :  { %v3428_v20 = vpop.f32.mrb[41].mxu0 }
 0x1b3   :  { %v3430_v23 = vpop.f32.mrb[42].mxu0 }
 0x1b4   :  { %v3432_v24 = vpop.f32.mrb[43].mxu0 }
 0x1b9   :  { %v3434_v26 = vpop.f32.mrb[44].mxu0 }
 0x1ba   :  { %v3436_v6 = vpop.f32.mrb[45].mxu0 }
 0x1bb   :  { %v3438_v28 = vpop.f32.mrb[46].mxu0 }
 0x1bc   :  { %v3440_v32 = vpop.f32.mrb[47].mxu0 }
 0x1c1   :  { %v3442_v34 = vpop.f32.mrb[48].mxu0 }
 0x1c2   :  { %v3444_v38 = vpop.f32.mrb[49].mxu0 }
 0x1c3   :  { %v3446_v40 = vpop.f32.mrb[50].mxu0 }
 0x1c4   :  { %v3448_v43 = vpop.f32.mrb[51].mxu0 }
 0x1c9   :  { %v3450_v44 = vpop.f32.mrb[52].mxu0 }
 0x1ca   :  { %3820 = vst [vmem:[#allocation27_spill] sm:$0xff] %v3450_v44  ;;  %v3452_v47 = vpop.f32.mrb[53].mxu0 }
 0x1cb   :  { %v3454_v49 = vpop.f32.mrb[54].mxu0 }
 0x1cc   :  { %3821 = vst [vmem:[#allocation28_spill] sm:$0xff] %v3454_v49  ;;  %v3456_v51 = vpop.f32.mrb[55].mxu0 }
 0x1d1   :  { %v3458_v52 = vpop.f32.mrb[56].mxu0 }
 0x1d2   :  { %3822 = vst [vmem:[#allocation29_spill] sm:$0xff] %v3458_v52  ;;  %v3460_v55 = vpop.f32.mrb[57].mxu0 }
 0x1d3   :  { %3823 = vst [vmem:[#allocation30_spill] sm:$0xff] %v3460_v55  ;;  %v3462_v57 = vpop.f32.mrb[58].mxu0 }
 0x1d4   :  { %3824 = vst [vmem:[#allocation31_spill] sm:$0xff] %v3462_v57  ;;  %v3464_v59 = vpop.f32.mrb[59].mxu0 }
 0x1d5   :  { %3825 = vst [vmem:[#allocation32_spill] sm:$0xff] %v3464_v59 }
 0x1d9   :  { %v3466_v2 = vpop.f32.mrb[60].mxu0 }
 0x1da   :  { %3826 = vst [vmem:[#allocation33_spill] sm:$0xff] %v3466_v2  ;;  %v3468_v61 = vpop.f32.mrb[61].mxu0 }
 0x1db   :  { %3827 = vst [vmem:[#allocation34_spill] sm:$0xff] %v3468_v61  ;;  %v3470_v0 = vpop.f32.mrb[62].mxu0 }
 0x1dc   :  { %3828 = vst [vmem:[#allocation35_spill] sm:$0xff] %v3470_v0  ;;  %v3472_v10 = vpop.f32.mrb[63].mxu0 }
 0x1dd   :  { %3829 = vst [vmem:[#allocation36_spill] sm:$0xff] %v3472_v10 }
 0x244   :  { %v2462_v21 = vpop.f32.mrb[0].mxu1 }
 0x245   :  { %2849 = vlog2.f32 %v2462_v21  ;;  %v593_v17 = vpop.f32.mrb[1].mxu1 }
 0x246   :  { %2851 = vlog2.f32 %v593_v17 }
 0x248   :  { %v2465_v13 = vpop.f32.mrb[2].mxu1 }
 0x249   :  { %2853 = vlog2.f32 %v2465_v13  ;;  %v603_v52 = vpop.f32.mrb[3].mxu1 }
 0x24a   :  { %2855 = vlog2.f32 %v603_v52 }
 0x24c   :  { %v2468_v8 = vpop.f32.mrb[4].mxu1 }
 0x24d   :  { %2857 = vlog2.f32 %v2468_v8  ;;  %v613_v57 = vpop.f32.mrb[5].mxu1 }
 0x24e   :  { %2859 = vlog2.f32 %v613_v57 }
 0x24f   :  { %v2850_v55 = vpop.eup %2849 }
 0x250   :  { %v2852_v2 = vpop.eup %2851  ;;  %v755_v59 = vmul.f32 0.6931472, %v2850_v55  ;;  %v2471_v61 = vpop.f32.mrb[6].mxu1 }
 0x251   :  { %v753_v62 = vmul.f32 0.6931472, %v2852_v2  ;;  %2861 = vlog2.f32 %v2471_v61  ;;  %v623_v0 = vpop.f32.mrb[7].mxu1 }
 0x252   :  { %2863 = vlog2.f32 %v623_v0  ;;  %v817_v21 = vsub.f32 %v3302_v27, %v755_v59 }
 0x253   :  { %v2854_v10 = vpop.eup %2853  ;;  %v816_v17 = vsub.f32 %v3305_v29, %v753_v62 }
 0x254   :  { %v2856_v13 = vpop.eup %2855  ;;  %v759_v58 = vmul.f32 0.6931472, %v2854_v10  ;;  %v2474_v52 = vpop.f32.mrb[8].mxu1  ;;  %v849_v44 = vmax.f32 %v817_v21, -20.723267 }
 0x255   :  { %v757_v8 = vmul.f32 0.6931472, %v2856_v13  ;;  %2865 = vlog2.f32 %v2474_v52  ;;  %v633_v57 = vpop.f32.mrb[9].mxu1  ;;  %v848_v49 = vmax.f32 %v816_v17, -20.723267 }
 0x256   :  { %2867 = vlog2.f32 %v633_v57  ;;  %v819_v55 = vsub.f32 %v3308_v31, %v759_v58  ;;  %v881_v2 = vmin.f32 %v849_v44, -1e-09 }
 0x257   :  { %v2858_v61 = vpop.eup %2857  ;;  %v818_v0 = vsub.f32 %v3311_v33, %v757_v8  ;;  %v880_v54 = vmin.f32 %v848_v49, -1e-09 }
 0x258   :  { %v2860_v27 = vpop.eup %2859  ;;  %v763_v59 = vmul.f32 0.6931472, %v2858_v61  ;;  %v851_v50 = vmax.f32 %v819_v55, -20.723267  ;;  %v1234_v29 = vmul.f32 %v3415_v4, %v881_v2  ;;  %v2477_v62 = vpop.f32.mrb[10].mxu1 }
 0x259   :  { %v761_v10 = vmul.f32 0.6931472, %v2860_v27  ;;  %v850_v21 = vmax.f32 %v818_v0, -20.723267  ;;  %v1233_v13 = vmul.f32 %v3411_v7, %v880_v54  ;;  %2869 = vlog2.f32 %v2477_v62  ;;  %v643_v17 = vpop.f32.mrb[11].mxu1  ;;  %2588 = vmatprep.mubr.f32.mxu1 %v880_v54 }
 0x25a   :  { %v883_v52 = vmin.f32 %v851_v50, -1e-09  ;;  %2871 = vlog2.f32 %v643_v17  ;;  %1267 = vadd.xlane.f32.xlu0 %v1234_v29  ;;  %2589 = vmatmul.mubr.f32.vlgmr.msra.gmra.mrb[32].mxu1 %v881_v2  ;;  %v821_v31 = vsub.f32 %v3314_v35, %v763_v59 }
 0x25b   :  { %v2862_v33 = vpop.eup %2861  ;;  %v882_v58 = vmin.f32 %v850_v21, -1e-09  ;;  %v820_v44 = vsub.f32 %v3317_v37, %v761_v10 }
 0x25c   :  { %v2864_v49 = vpop.eup %2863  ;;  %v767_v4 = vmul.f32 0.6931472, %v2862_v33  ;;  %v1236_v8 = vmul.f32 %v3413_v3, %v883_v52  ;;  %v2480_v57 = vpop.f32.mrb[12].mxu1  ;;  %v853_v55 = vmax.f32 %v821_v31, -20.723267 }
 0x25d   :  { %v765_v7 = vmul.f32 0.6931472, %v2864_v49  ;;  %v1235_v61 = vmul.f32 %v3407_v1, %v882_v58  ;;  %2873 = vlog2.f32 %v2480_v57  ;;  %v653_v50 = vpop.f32.mrb[13].mxu1  ;;  %v852_v54 = vmax.f32 %v820_v44, -20.723267  ;;  %2591 = vmatprep.mubr.f32.mxu1 %v882_v58 }
 0x25e   :  { %2875 = vlog2.f32 %v653_v50  ;;  %1271 = vadd.xlane.f32.xlu1 %v1236_v8  ;;  %1265 = vadd.xlane.f32.xlu0 %v1233_v13  ;;  %v823_v35 = vsub.f32 %v3320_v39, %v767_v4  ;;  %v885_v2 = vmin.f32 %v853_v55, -1e-09 }
 0x25f   :  { %v2866_v37 = vpop.eup %2865  ;;  %v822_v0 = vsub.f32 %v3323_v41, %v765_v7  ;;  %v884_v27 = vmin.f32 %v852_v54, -1e-09  ;;  %2592 = vmatmul.mubr.f32.gmra.mrb[34].mxu1 %v883_v52 }
 0x260   :  { %v2868_v3 = vpop.eup %2867  ;;  %v771_v59 = vmul.f32 0.6931472, %v2866_v37  ;;  %v855_v29 = vmax.f32 %v823_v35, -20.723267  ;;  %v1238_v1 = vmul.f32 %v3424_v5, %v885_v2  ;;  %v2483_v62 = vpop.f32.mrb[14].mxu1 }
 0x261   :  { %v769_v10 = vmul.f32 0.6931472, %v2868_v3  ;;  %v854_v21 = vmax.f32 %v822_v0, -20.723267  ;;  %v1237_v17 = vmul.f32 %v3420_v14, %v884_v27  ;;  %2877 = vlog2.f32 %v2483_v62  ;;  %v663_v13 = vpop.f32.mrb[15].mxu1  ;;  %2594 = vmatprep.mubr.f32.mxu1 %v884_v27 }
 0x262   :  { %v887_v39 = vmin.f32 %v855_v29, -1e-09  ;;  %2879 = vlog2.f32 %v663_v13  ;;  %1269 = vadd.xlane.f32.xlu1 %v1235_v61  ;;  %1275 = vadd.xlane.f32.xlu0 %v1238_v1  ;;  %v825_v41 = vsub.f32 %v3326_v46, %v771_v59 }
 0x263   :  { %v2870_v52 = vpop.eup %2869  ;;  %v886_v31 = vmin.f32 %v854_v21, -1e-09  ;;  %2595 = vmatmul.mubr.f32.gmra.mrb[36].mxu1 %v885_v2  ;;  %v824_v33 = vsub.f32 %v3329_v48, %v769_v10 }
 0x264   :  { %v2872_v5 = vpop.eup %2871  ;;  %v775_v58 = vmul.f32 0.6931472, %v2870_v52  ;;  %v1240_v44 = vmul.f32 %v3422_v15, %v887_v39  ;;  %v2486_v49 = vpop.f32.mrb[16].mxu1  ;;  %v857_v14 = vmax.f32 %v825_v41, -20.723267 }
 0x265   :  { %v773_v4 = vmul.f32 0.6931472, %v2872_v5  ;;  %v1239_v8 = vmul.f32 %v3418_v11, %v886_v31  ;;  %2881 = vlog2.f32 %v2486_v49  ;;  %v673_v57 = vpop.f32.mrb[17].mxu1  ;;  %v856_v55 = vmax.f32 %v824_v33, -20.723267  ;;  %2597 = vmatprep.mubr.f32.mxu1 %v886_v31 }
 0x266   :  { %2883 = vlog2.f32 %v673_v57  ;;  %1273 = vadd.xlane.f32.xlu1 %v1237_v17  ;;  %1279 = vadd.xlane.f32.xlu0 %v1240_v44  ;;  %v827_v46 = vsub.f32 %v3333_v53, %v775_v58  ;;  %v889_v7 = vmin.f32 %v857_v14, -1e-09 }
 0x267   :  { %v2874_v48 = vpop.eup %2873  ;;  %v826_v61 = vsub.f32 %v3336_v56, %v773_v4  ;;  %v888_v50 = vmin.f32 %v856_v55, -1e-09  ;;  %2598 = vmatmul.mubr.f32.gmra.mrb[38].mxu1 %v887_v39 }
 0x268   :  { %v2876_v15 = vpop.eup %2875  ;;  %v779_v54 = vmul.f32 0.6931472, %v2874_v48  ;;  %v859_v35 = vmax.f32 %v827_v46, -20.723267  ;;  %v1242_v11 = vmul.f32 %v3432_v24, %v889_v7  ;;  %v2489_v2 = vpop.f32.mrb[18].mxu1 }
 0x269   :  { %v777_v37 = vmul.f32 0.6931472, %v2876_v15  ;;  %v858_v0 = vmax.f32 %v826_v61, -20.723267  ;;  %v1241_v27 = vmul.f32 %v3428_v20, %v888_v50  ;;  %2885 = vlog2.f32 %v2489_v2  ;;  %v683_v3 = vpop.f32.mrb[19].mxu1  ;;  %2600 = vmatprep.mubr.f32.mxu1 %v888_v50 }
 0x26a   :  { %v891_v53 = vmin.f32 %v859_v35, -1e-09  ;;  %2887 = vlog2.f32 %v683_v3  ;;  %1277 = vadd.xlane.f32.xlu1 %v1239_v8  ;;  %1283 = vadd.xlane.f32.xlu0 %v1242_v11  ;;  %v829_v56 = vsub.f32 %v3339_v60, %v779_v54 }
 0x26b   :  { %v2878_v59 = vpop.eup %2877  ;;  %v890_v29 = vmin.f32 %v858_v0, -1e-09  ;;  %2601 = vmatmul.mubr.f32.gmra.mrb[40].mxu1 %v889_v7  ;;  %v828_v1 = vsub.f32 %v3342_v63, %v777_v37 }
 0x26c   :  { %v2880_v24 = vpop.eup %2879  ;;  %v783_v62 = vmul.f32 0.6931472, %v2878_v59  ;;  %v1244_v10 = vmul.f32 %v3430_v23, %v891_v53  ;;  %v2492_v21 = vpop.f32.mrb[20].mxu1  ;;  %v861_v20 = vmax.f32 %v829_v56, -20.723267 }
 0x26d   :  { %v781_v17 = vmul.f32 0.6931472, %v2880_v24  ;;  %v1243_v13 = vmul.f32 %v3426_v18, %v890_v29  ;;  %2889 = vlog2.f32 %v2492_v21  ;;  %v693_v39 = vpop.f32.mrb[21].mxu1  ;;  %v860_v41 = vmax.f32 %v828_v1, -20.723267  ;;  %2603 = vmatprep.mubr.f32.mxu1 %v890_v29 }
 0x26e   :  { %2891 = vlog2.f32 %v693_v39  ;;  %1281 = vadd.xlane.f32.xlu1 %v1241_v27  ;;  %1287 = vadd.xlane.f32.xlu0 %v1244_v10  ;;  %v831_v60 = vsub.f32 %v3345_v9, %v783_v62  ;;  %v893_v52 = vmin.f32 %v861_v20, -1e-09 }
 0x26f   :  { %v2882_v63 = vpop.eup %2881  ;;  %v830_v31 = vsub.f32 %v3348_v12, %v781_v17  ;;  %v892_v33 = vmin.f32 %v860_v41, -1e-09  ;;  %2604 = vmatmul.mubr.f32.gmra.mrb[42].mxu1 %v891_v53 }
 0x270   :  { %v2884_v23 = vpop.eup %2883  ;;  %v787_v5 = vmul.f32 0.6931472, %v2882_v63  ;;  %v863_v58 = vmax.f32 %v831_v60, -20.723267  ;;  %v1246_v18 = vmul.f32 %v3440_v32, %v893_v52  ;;  %v2495_v44 = vpop.f32.mrb[22].mxu1 }
 0x271   :  { %v785_v49 = vmul.f32 0.6931472, %v2884_v23  ;;  %v862_v14 = vmax.f32 %v830_v31, -20.723267  ;;  %v1245_v4 = vmul.f32 %v3436_v6, %v892_v33  ;;  %2893 = vlog2.f32 %v2495_v44  ;;  %v703_v8 = vpop.f32.mrb[23].mxu1  ;;  %2606 = vmatprep.mubr.f32.mxu1 %v892_v33 }
 0x272   :  { %v895_v9 = vmin.f32 %v863_v58, -1e-09  ;;  %2895 = vlog2.f32 %v703_v8  ;;  %1285 = vadd.xlane.f32.xlu1 %v1243_v13  ;;  %1291 = vadd.xlane.f32.xlu0 %v1246_v18  ;;  %v833_v12 = vsub.f32 %v3351_v16, %v787_v5  ;;  %v3831_v8 = vld [vmem:[#allocation20_spill] sm:$0xff] }
 0x273   :  { %v2886_v57 = vpop.eup %2885  ;;  %v894_v55 = vmin.f32 %v862_v14, -1e-09  ;;  %2607 = vmatmul.mubr.f32.gmra.mrb[44].mxu1 %v893_v52  ;;  %v832_v46 = vsub.f32 %v3354_v19, %v785_v49 }
 0x274   :  { %v2888_v32 = vpop.eup %2887  ;;  %v791_v7 = vmul.f32 0.6931472, %v2886_v57  ;;  %v1248_v48 = vmul.f32 %v3438_v28, %v895_v9  ;;  %v2498_v61 = vpop.f32.mrb[24].mxu1  ;;  %v865_v6 = vmax.f32 %v833_v12, -20.723267  ;;  %v3832_v57 = vld [vmem:[#allocation28_spill] sm:$0xff] }
 0x275   :  { %v789_v50 = vmul.f32 0.6931472, %v2888_v32  ;;  %v1247_v15 = vmul.f32 %v3434_v26, %v894_v55  ;;  %2897 = vlog2.f32 %v2498_v61  ;;  %v713_v54 = vpop.f32.mrb[25].mxu1  ;;  %v864_v35 = vmax.f32 %v832_v46, -20.723267  ;;  %2609 = vmatprep.mubr.f32.mxu1 %v894_v55  ;;  %v3833_v32 = vld [vmem:[#allocation27_spill] sm:$0xff] }
 0x276   :  { %2899 = vlog2.f32 %v713_v54  ;;  %1289 = vadd.xlane.f32.xlu1 %v1245_v4  ;;  %1295 = vadd.xlane.f32.xlu0 %v1248_v48  ;;  %v835_v16 = vsub.f32 %v3357_v22, %v791_v7  ;;  %v897_v11 = vmin.f32 %v865_v6, -1e-09  ;;  %v3834_v61 = vld [vmem:[#allocation21_spill] sm:$0xff]  ;;  %v3835_v54 = vld [vmem:[#allocation22_spill] sm:$0xff] }
 0x277   :  { %v2890_v19 = vpop.eup %2889  ;;  %v834_v2 = vsub.f32 %v3360_v25, %v789_v50  ;;  %v896_v37 = vmin.f32 %v864_v35, -1e-09  ;;  %2610 = vmatmul.mubr.f32.gmra.mrb[46].mxu1 %v895_v9 }
 0x278   :  { %v2892_v28 = vpop.eup %2891  ;;  %v795_v0 = vmul.f32 0.6931472, %v2890_v19  ;;  %v867_v27 = vmax.f32 %v835_v16, -20.723267  ;;  %v1250_v26 = vmul.f32 %v3448_v43, %v897_v11  ;;  %v2501_v3 = vpop.f32.mrb[26].mxu1 }
 0x279   :  { %v793_v53 = vmul.f32 0.6931472, %v2892_v28  ;;  %v866_v56 = vmax.f32 %v834_v2, -20.723267  ;;  %v1249_v59 = vmul.f32 %v3444_v38, %v896_v37  ;;  %2901 = vlog2.f32 %v2501_v3  ;;  %v723_v29 = vpop.f32.mrb[27].mxu1  ;;  %2612 = vmatprep.mubr.f32.mxu1 %v896_v37  ;;  %v3836_v37 = vld [vmem:[#allocation32_spill] sm:$0xff] }
 0x27a   :  { %v899_v22 = vmin.f32 %v867_v27, -1e-09  ;;  %2903 = vlog2.f32 %v723_v29  ;;  %1293 = vadd.xlane.f32.xlu1 %v1247_v15  ;;  %1299 = vadd.xlane.f32.xlu0 %v1250_v26  ;;  %v837_v25 = vsub.f32 %v3363_v30, %v795_v0  ;;  %v3837_v26 = vld [vmem:[#allocation30_spill] sm:$0xff] }
 0x27b   :  { %v2894_v1 = vpop.eup %2893  ;;  %v898_v24 = vmin.f32 %v866_v56, -1e-09  ;;  %2613 = vmatmul.mubr.f32.gmra.mrb[48].mxu1 %v897_v11  ;;  %v836_v62 = vsub.f32 %v3366_v36, %v793_v53  ;;  %v3838_v56 = vld [vmem:[#allocation23_spill] sm:$0xff] }
 0x27c   :  { %v2896_v43 = vpop.eup %2895  ;;  %v799_v10 = vmul.f32 0.6931472, %v2894_v1  ;;  %v1252_v21 = vmul.f32 %v3446_v40, %v899_v22  ;;  %v2504_v20 = vpop.f32.mrb[28].mxu1  ;;  %v869_v38 = vmax.f32 %v837_v25, -20.723267  ;;  %v3839_v25 = vld [vmem:[#allocation24_spill] sm:$0xff] }
 0x27d   :  { %v797_v17 = vmul.f32 0.6931472, %v2896_v43  ;;  %v1251_v13 = vmul.f32 %v3442_v34, %v898_v24  ;;  %2905 = vlog2.f32 %v2504_v20  ;;  %v733_v39 = vpop.f32.mrb[29].mxu1  ;;  %v868_v41 = vmax.f32 %v836_v62, -20.723267  ;;  %2615 = vmatprep.mubr.f32.mxu1 %v898_v24  ;;  %v3840_v43 = vld [vmem:[#allocation31_spill] sm:$0xff] }
 0x27e   :  { %2907 = vlog2.f32 %v733_v39  ;;  %1297 = vadd.xlane.f32.xlu1 %v1249_v59  ;;  %1303 = vadd.xlane.f32.xlu0 %v1252_v21  ;;  %v839_v30 = vsub.f32 %v3369_v42, %v799_v10  ;;  %v901_v60 = vmin.f32 %v869_v38, -1e-09  ;;  %v3841_v38 = vld [vmem:[#allocation29_spill] sm:$0xff] }
 0x27f   :  { %v2898_v36 = vpop.eup %2897  ;;  %v838_v52 = vsub.f32 %v3372_v45, %v797_v17  ;;  %v900_v63 = vmin.f32 %v868_v41, -1e-09  ;;  %2616 = vmatmul.mubr.f32.gmra.mrb[50].mxu1 %v899_v22  ;;  %v3830_v45 = vld [vmem:[#allocation19_spill] sm:$0xff]  ;;  %v3842_v39 = vld [vmem:[#allocation25_spill] sm:$0xff] }
 0x280   :  { %v2900_v40 = vpop.eup %2899  ;;  %v803_v31 = vmul.f32 0.6931472, %v2898_v36  ;;  %v871_v33 = vmax.f32 %v839_v30, -20.723267  ;;  %v1254_v34 = vmul.f32 %v3456_v51, %v901_v60  ;;  %v2507_v23 = vpop.f32.mrb[30].mxu1 }
 0x281   :  { %v801_v5 = vmul.f32 0.6931472, %v2900_v40  ;;  %v870_v58 = vmax.f32 %v838_v52, -20.723267  ;;  %v1253_v18 = vmul.f32 %v3452_v47, %v900_v63  ;;  %2909 = vlog2.f32 %v2507_v23  ;;  %v743_v44 = vpop.f32.mrb[31].mxu1  ;;  %2618 = vmatprep.mubr.f32.mxu1 %v900_v63  ;;  %v3844_v40 = vld [vmem:[#allocation36_spill] sm:$0xff] }
 0x282   :  { %v903_v42 = vmin.f32 %v871_v33, -1e-09  ;;  %2911 = vlog2.f32 %v743_v44  ;;  %1301 = vadd.xlane.f32.xlu1 %v1251_v13  ;;  %1307 = vadd.xlane.f32.xlu0 %v1254_v34  ;;  %v841_v49 = vsub.f32 %v3830_v45, %v803_v31  ;;  %v3845_v34 = vld [vmem:[#allocation34_spill] sm:$0xff] }
 0x283   :  { %v2902_v14 = vpop.eup %2901  ;;  %v902_v4 = vmin.f32 %v870_v58, -1e-09  ;;  %2619 = vmatmul.mubr.f32.gmra.mrb[52].mxu1 %v901_v60  ;;  %v840_v9 = vsub.f32 %v3831_v8, %v801_v5  ;;  %v3843_v60 = vld [vmem:[#allocation26_spill] sm:$0xff] }
 0x284   :  { %v2904_v51 = vpop.eup %2903  ;;  %v807_v12 = vmul.f32 0.6931472, %v2902_v14  ;;  %v1256_v55 = vmul.f32 %v3832_v57, %v903_v42  ;;  %v873_v46 = vmax.f32 %v841_v49, -20.723267  ;;  %v3538_v49 = vpop.xlane.xlu1 %1817 }
 0x285   :  { %v805_v47 = vmul.f32 0.6931472, %v2904_v51  ;;  %v1255_v7 = vmul.f32 %v3833_v32, %v902_v4  ;;  %v872_v48 = vmax.f32 %v840_v9, -20.723267  ;;  %2621 = vmatprep.mubr.f32.mxu1 %v902_v4  ;;  %v3540_v14 = vpop.xlane.xlu0 %1819 }
 0x286   :  { %1305 = vadd.xlane.f32.xlu1 %v1253_v18  ;;  %1311 = vadd.xlane.f32.xlu0 %v1256_v55  ;;  %v843_v6 = vsub.f32 %v3834_v61, %v807_v12  ;;  %v905_v50 = vmin.f32 %v873_v46, -1e-09  ;;  %v3846_v18 = vld [vmem:[#allocation35_spill] sm:$0xff] }
 0x287   :  { %v2906_v15 = vpop.eup %2905  ;;  %v842_v35 = vsub.f32 %v3835_v54, %v805_v47  ;;  %v904_v16 = vmin.f32 %v872_v48, -1e-09  ;;  %2622 = vmatmul.mubr.f32.gmra.mrb[54].mxu1 %v903_v42  ;;  %v3847_v42 = vld [vmem:[#allocation33_spill] sm:$0xff] }
 0x288   :  { %v2908_v11 = vpop.eup %2907  ;;  %v811_v19 = vmul.f32 0.6931472, %v2906_v15  ;;  %v875_v2 = vmax.f32 %v843_v6, -20.723267  ;;  %v1258_v28 = vmul.f32 %v3836_v37, %v905_v50  ;;  %v3542_v4 = vpop.xlane.xlu1 %1821  ;;  %v3567_v37 = vld [vmem:[%s3802_s6] ss:$0 sm:$0xff] }
 0x289   :  { %v809_v0 = vmul.f32 0.6931472, %v2908_v11  ;;  %v874_v27 = vmax.f32 %v842_v35, -20.723267  ;;  %v1257_v3 = vmul.f32 %v3837_v26, %v904_v16  ;;  %2624 = vmatprep.mubr.f32.mxu1 %v904_v16  ;;  %v3544_v8 = vpop.xlane.xlu0 %1823  ;;  %s3153_s6 = smov [#allocation13]  }
 0x28a   :  { %v907_v53 = vmin.f32 %v875_v2, -1e-09  ;;  %1309 = vadd.xlane.f32.xlu1 %v1255_v7  ;;  %1315 = vadd.xlane.f32.xlu0 %v1258_v28  ;;  %v845_v59 = vsub.f32 %v3838_v56, %v811_v19  ;;  %s2026_s12 = sshll.u32 %s3153_s6, 4  ;;  %s2027_s12 = int_to_ptr.vmem [resolvable:$true] %s2026_s12 }
 0x28b   :  { %v2910_v29 = vpop.eup %2909  ;;  %v906_v22 = vmin.f32 %v874_v27, -1e-09  ;;  %2625 = vmatmul.mubr.f32.gmra.mrb[56].mxu1 %v905_v50  ;;  %v844_v1 = vsub.f32 %v3839_v25, %v809_v0  ;;  %s3111_s0 = scalar_lea.vmem %s2027_s12, 128  ;;  %p3116_p7 = scmp.lt.s32.totalorder %s2027_s12, %s2027_s12 }
 0x28c   :  { %v2912_v24 = vpop.eup %2911  ;;  %v815_v62 = vmul.f32 0.6931472, %v2910_v29  ;;  %v1260_v10 = vmul.f32 %v3840_v43, %v907_v53  ;;  %v877_v21 = vmax.f32 %v845_v59, -20.723267  ;;  %v3546_v9 = vpop.xlane.xlu1 %1825  ;;  %p3112_p6 = scmp.ne.s32.totalorder %s2027_s12, %s3111_s0  ;;  %p3117_p8 = scmp.lt.s32.totalorder %s3111_s0, %s3111_s0 }
 0x28d   :  { %v813_v20 = vmul.f32 0.6931472, %v2912_v24  ;;  %v1259_v17 = vmul.f32 %v3841_v38, %v906_v22  ;;  %v876_v13 = vmax.f32 %v844_v1, -20.723267  ;;  %2627 = vmatprep.mubr.f32.mxu1 %v906_v22  ;;  %v3548_v51 = vpop.xlane.xlu0 %1827 }
 0x28e   :  { %1313 = vadd.xlane.f32.xlu1 %v1257_v3  ;;  %1319 = vadd.xlane.f32.xlu0 %v1260_v10  ;;  %v847_v41 = vsub.f32 %v3842_v39, %v815_v62  ;;  %v909_v30 = vmin.f32 %v877_v21, -1e-09  ;;  %p3118_p9 = por %p3117_p8, %p3116_p7 }
 0x28f   :  { %v846_v36 = vsub.f32 %v3843_v60, %v813_v20  ;;  %v908_v52 = vmin.f32 %v876_v13, -1e-09  ;;  %2628 = vmatmul.mubr.f32.gmra.mrb[58].mxu1 %v907_v53 }
 0x290   :  { %v879_v63 = vmax.f32 %v847_v41, -20.723267  ;;  %v1262_v31 = vmul.f32 %v3844_v40, %v909_v30  ;;  %v3550_v12 = vpop.xlane.xlu1 %1829  ;;  %p3119_p10 = pnand %p3118_p9, %p3112_p6 }
 0x291   :  { %v878_v33 = vmax.f32 %v846_v36, -20.723267  ;;  %v1261_v23 = vmul.f32 %v3845_v34, %v908_v52  ;;  %2630 = vmatprep.mubr.f32.mxu1 %v908_v52  ;;  %v3552_v57 = vpop.xlane.xlu0 %1831 }
 0x292   :  { %v911_v5 = vmin.f32 %v879_v63, -1e-09  ;;  %1317 = vadd.xlane.f32.xlu1 %v1259_v17  ;;  %1323 = vadd.xlane.f32.xlu0 %v1262_v31  ;;  %v2977_v63 = vld [vmem:[#allocation5 + $0x70] sm:$0xff]  }
 0x293   :  { %v910_v58 = vmin.f32 %v878_v33, -1e-09  ;;  %2631 = vmatmul.mubr.f32.gmra.mrb[60].mxu1 %v909_v30  ;;  %v1814_v40 = vunpack.c.h.bf16 %v2977_v63 }
 0x294   :  { %v1264_v44 = vmul.f32 %v3846_v18, %v911_v5  ;;  %v3554_v55 = vpop.xlane.xlu1 %1833 }
 0x295   :  { %v1263_v45 = vmul.f32 %v3847_v42, %v910_v58  ;;  %2633 = vmatprep.mubr.f32.mxu1 %v910_v58  ;;  %v3556_v48 = vpop.xlane.xlu0 %1835 }
 0x296   :  { %1321 = vadd.xlane.f32.xlu1 %v1261_v23  ;;  %1327 = vadd.xlane.f32.xlu0 %v1264_v44 }
 0x297   :  { %2634 = vmatmul.mubr.f32.gmra.mrb[62].mxu1 %v911_v5 }
 0x298   :  { %v3558_v61 = vpop.xlane.xlu1 %1837 }
 0x299   :  { %v3560_v35 = vpop.xlane.xlu0 %1839 }
 0x29a   :  { %1325 = vadd.xlane.f32.xlu1 %v1263_v45 }
 0x29c   :  { %v3562_v11 = vpop.xlane.xlu1 %1841 }
 0x29d   :  { %v3570_v56 = vpop.xlane.xlu0 %1843 }
 0x2a0   :  { %v3573_v22 = vpop.xlane.xlu1 %1845 }
 0x2a1   :  { %v3576_v20 = vpop.xlane.xlu0 %1847 }
 0x2a4   :  { %v3578_v17 = vpop.xlane.xlu1 %1849 }
 0x2a5   :  { %v3582_v23 = vpop.xlane.xlu0 %1851 }
 0x2a8   :  { %v3584_v18 = vpop.xlane.xlu1 %1853 }
 0x32d   :  { %v2590_v46 = vpop.f32.mrb[32].mxu1 }
 0x32e   :  { %v1621_v47 = vmul.f32 1.442695, %v2590_v46  ;;  %v1459_v32 = vpop.f32.mrb[33].mxu1 }
 0x32f   :  { %v1619_v7 = vmul.f32 1.442695, %v1459_v32 }
 0x330   :  { %2913 = vpow2.f32 %v1621_v47 }
 0x331   :  { %2915 = vpow2.f32 %v1619_v7 }
 0x332   :  { %v2593_v6 = vpop.f32.mrb[34].mxu1 }
 0x333   :  { %v1625_v50 = vmul.f32 1.442695, %v2593_v6  ;;  %v1469_v15 = vpop.f32.mrb[35].mxu1 }
 0x334   :  { %v1623_v54 = vmul.f32 1.442695, %v1469_v15  ;;  %v3589_v15 = vpop.xlane.xlu0 %1855 }
 0x335   :  { %2917 = vpow2.f32 %v1625_v50 }
 0x336   :  { %v2596_v16 = vpop.f32.mrb[36].mxu1  ;;  %2919 = vpow2.f32 %v1623_v54 }
 0x337   :  { %v1479_v19 = vpop.f32.mrb[37].mxu1  ;;  %v1629_v26 = vmul.f32 1.442695, %v2596_v16  ;;  %v3591_v16 = vpop.xlane.xlu1 %1857 }
 0x338   :  { %v1627_v2 = vmul.f32 1.442695, %v1479_v19 }
 0x33a   :  { %v2914_v28 = vpop.eup %2913  ;;  %2921 = vpow2.f32 %v1627_v2  ;;  %v2599_v0 = vpop.f32.mrb[38].mxu1 }
 0x33b   :  { %v2916_v27 = vpop.eup %2915  ;;  %v1489_v3 = vpop.f32.mrb[39].mxu1  ;;  %v1690_v53 = vmul.f32 %v2914_v28, %v3567_v37  ;;  %v1633_v24 = vmul.f32 1.442695, %v2599_v0 }
 0x33c   :  { %v1631_v59 = vmul.f32 1.442695, %v1489_v3  ;;  %v1689_v29 = vmul.f32 %v2916_v27, %v3567_v37 }
 0x33d   :  { %1723 = vadd.xlane.f32.xlu0 %v1690_v53 }
 0x33e   :  { %2923 = vpow2.f32 %v1631_v59  ;;  %v2602_v25 = vpop.f32.mrb[40].mxu1  ;;  %1721 = vadd.xlane.f32.xlu1 %v1689_v29 }
 0x33f   :  { %v2918_v1 = vpop.eup %2917  ;;  %2925 = vpow2.f32 %v1629_v26  ;;  %v1499_v62 = vpop.f32.mrb[41].mxu1  ;;  %v1637_v13 = vmul.f32 1.442695, %v2602_v25 }
 0x340   :  { %v1635_v43 = vmul.f32 1.442695, %v1499_v62  ;;  %v1692_v10 = vmul.f32 %v2918_v1, %v3567_v37  ;;  %v2920_v21 = vpop.eup %2919  ;;  %v3595_v1 = vpop.xlane.xlu0 %1859 }
 0x341   :  { %v1691_v60 = vmul.f32 %v2920_v21, %v3567_v37 }
 0x342   :  { %2927 = vpow2.f32 %v1635_v43  ;;  %1727 = vadd.xlane.f32.xlu0 %v1692_v10  ;;  %v2605_v38 = vpop.f32.mrb[42].mxu1  ;;  %v3598_v10 = vpop.xlane.xlu1 %1861 }
 0x343   :  { %2929 = vpow2.f32 %v1633_v24  ;;  %v1509_v39 = vpop.f32.mrb[43].mxu1  ;;  %v1641_v31 = vmul.f32 1.442695, %v2605_v38 }
 0x344   :  { %v2922_v41 = vpop.eup %2921  ;;  %v1639_v30 = vmul.f32 1.442695, %v1509_v39  ;;  %v3603_v63 = vpop.xlane.xlu0 %1863 }
 0x345   :  { %v1693_v36 = vmul.f32 %v2922_v41, %v3567_v37  ;;  %3848 = vst [vmem:[#allocation19_spill] sm:$0xff] %v3603_v63 }
 0x346   :  { %2931 = vpow2.f32 %v1639_v30  ;;  %1725 = vadd.xlane.f32.xlu0 %v1691_v60  ;;  %v2608_v52 = vpop.f32.mrb[44].mxu1 }
 0x347   :  { %2933 = vpow2.f32 %v1637_v13  ;;  %v1519_v33 = vpop.f32.mrb[45].mxu1  ;;  %1729 = vadd.xlane.f32.xlu1 %v1693_v36  ;;  %v1645_v45 = vmul.f32 1.442695, %v2608_v52 }
 0x348   :  { %v2924_v34 = vpop.eup %2923  ;;  %v1643_v5 = vmul.f32 1.442695, %v1519_v33 }
 0x349   :  { %v2926_v58 = vpop.eup %2925  ;;  %v1695_v44 = vmul.f32 %v2924_v34, %v3567_v37 }
 0x34a   :  { %2935 = vpow2.f32 %v1643_v5  ;;  %1875 = vadd.xlane.f32.xlu0 %v1814_v40  ;;  %v2611_v42 = vpop.f32.mrb[46].mxu1  ;;  %v1694_v7 = vmul.f32 %v2926_v58, %v3567_v37 }
 0x34b   :  { %2937 = vpow2.f32 %v1641_v31  ;;  %v1529_v46 = vpop.f32.mrb[47].mxu1  ;;  %1733 = vadd.xlane.f32.xlu1 %v1695_v44  ;;  %v1649_v19 = vmul.f32 1.442695, %v2611_v42  ;;  %v3605_v31 = vpop.xlane.xlu1 %1865 }
 0x34c   :  { %v2928_v47 = vpop.eup %2927  ;;  %v1647_v32 = vmul.f32 1.442695, %v1529_v46  ;;  %3849 = vst [vmem:[#allocation20_spill] sm:$0xff] %v3605_v31 }
 0x34d   :  { %v2930_v6 = vpop.eup %2929  ;;  %v1697_v50 = vmul.f32 %v2928_v47, %v3567_v37 }
 0x34e   :  { %2939 = vpow2.f32 %v1647_v32  ;;  %1731 = vadd.xlane.f32.xlu0 %v1694_v7  ;;  %v2614_v54 = vpop.f32.mrb[48].mxu1  ;;  %v1696_v27 = vmul.f32 %v2930_v6, %v3567_v37  ;;  %v3609_v6 = vpop.xlane.xlu0 %1867 }
 0x34f   :  { %2941 = vpow2.f32 %v1645_v45  ;;  %v1539_v2 = vpop.f32.mrb[49].mxu1  ;;  %1737 = vadd.xlane.f32.xlu1 %v1697_v50  ;;  %v1653_v59 = vmul.f32 1.442695, %v2614_v54  ;;  %3850 = vst [vmem:[#allocation28_spill] sm:$0xff] %v3609_v6 }
 0x350   :  { %v2932_v28 = vpop.eup %2931  ;;  %v1651_v0 = vmul.f32 1.442695, %v1539_v2  ;;  %v3612_v2 = vpop.xlane.xlu1 %1869 }
 0x351   :  { %v2934_v26 = vpop.eup %2933  ;;  %v1699_v3 = vmul.f32 %v2932_v28, %v3567_v37  ;;  %3851 = vst [vmem:[#allocation27_spill] sm:$0xff] %v3612_v2 }
 0x352   :  { %2943 = vpow2.f32 %v1651_v0  ;;  %1735 = vadd.xlane.f32.xlu0 %v1696_v27  ;;  %v2617_v53 = vpop.f32.mrb[50].mxu1  ;;  %v1698_v62 = vmul.f32 %v2934_v26, %v3567_v37 }
 0x353   :  { %2945 = vpow2.f32 %v1649_v19  ;;  %v1549_v29 = vpop.f32.mrb[51].mxu1  ;;  %1741 = vadd.xlane.f32.xlu1 %v1699_v3  ;;  %v1657_v13 = vmul.f32 1.442695, %v2617_v53 }
 0x354   :  { %v2936_v25 = vpop.eup %2935  ;;  %v1655_v24 = vmul.f32 1.442695, %v1549_v29 }
 0x355   :  { %v2938_v43 = vpop.eup %2937  ;;  %v1701_v21 = vmul.f32 %v2936_v25, %v3567_v37 }
 0x356   :  { %2947 = vpow2.f32 %v1655_v24  ;;  %1739 = vadd.xlane.f32.xlu0 %v1698_v62  ;;  %v2620_v38 = vpop.f32.mrb[52].mxu1  ;;  %v1700_v60 = vmul.f32 %v2938_v43, %v3567_v37  ;;  %v3617_v24 = vpop.xlane.xlu0 %1871 }
 0x357   :  { %2949 = vpow2.f32 %v1653_v59  ;;  %v1559_v39 = vpop.f32.mrb[53].mxu1  ;;  %1745 = vadd.xlane.f32.xlu1 %v1701_v21  ;;  %v1661_v33 = vmul.f32 1.442695, %v2620_v38  ;;  %3852 = vst [vmem:[#allocation21_spill] sm:$0xff] %v3617_v24  ;;  %v3619_v43 = vpop.xlane.xlu1 %1873 }
 0x358   :  { %v2940_v41 = vpop.eup %2939  ;;  %v1659_v30 = vmul.f32 1.442695, %v1559_v39  ;;  %3853 = vst [vmem:[#allocation22_spill] sm:$0xff] %v3619_v43 }
 0x359   :  { %v2942_v36 = vpop.eup %2941  ;;  %v1703_v52 = vmul.f32 %v2940_v41, %v3567_v37 }
 0x35a   :  { %2951 = vpow2.f32 %v1659_v30  ;;  %1743 = vadd.xlane.f32.xlu0 %v1700_v60  ;;  %v2623_v40 = vpop.f32.mrb[54].mxu1  ;;  %v1702_v44 = vmul.f32 %v2942_v36, %v3567_v37 }
 0x35b   :  { %2953 = vpow2.f32 %v1657_v13  ;;  %v1569_v34 = vpop.f32.mrb[55].mxu1  ;;  %1749 = vadd.xlane.f32.xlu1 %v1703_v52  ;;  %v1665_v47 = vmul.f32 1.442695, %v2623_v40 }
 0x35c   :  { %v2944_v5 = vpop.eup %2943  ;;  %v1663_v58 = vmul.f32 1.442695, %v1569_v34 }
 0x35d   :  { %v2946_v42 = vpop.eup %2945  ;;  %v1705_v45 = vmul.f32 %v2944_v5, %v3567_v37  ;;  %v3623_v5 = vpop.xlane.xlu0 %1267 }
 0x35e   :  { %2955 = vpow2.f32 %v1663_v58  ;;  %1747 = vadd.xlane.f32.xlu0 %v1702_v44  ;;  %v2626_v46 = vpop.f32.mrb[56].mxu1  ;;  %v1704_v54 = vmul.f32 %v2946_v42, %v3567_v37 }
 0x35f   :  { %2957 = vpow2.f32 %v1661_v33  ;;  %v1579_v32 = vpop.f32.mrb[57].mxu1  ;;  %1753 = vadd.xlane.f32.xlu1 %v1705_v45  ;;  %v1669_v27 = vmul.f32 1.442695, %v2626_v46  ;;  %v3626_v45 = vpop.xlane.xlu1 %1271 }
 0x360   :  { %v2948_v7 = vpop.eup %2947  ;;  %v1667_v50 = vmul.f32 1.442695, %v1579_v32 }
 0x361   :  { %v2950_v19 = vpop.eup %2949  ;;  %v1707_v28 = vmul.f32 %v2948_v7, %v3567_v37 }
 0x362   :  { %2959 = vpow2.f32 %v1667_v50  ;;  %1751 = vadd.xlane.f32.xlu0 %v1704_v54  ;;  %v2629_v0 = vpop.f32.mrb[58].mxu1  ;;  %v1706_v59 = vmul.f32 %v2950_v19, %v3567_v37  ;;  %v1266_v54 = vpop.xlane.xlu0 %1265 }
 0x363   :  { %2961 = vpow2.f32 %v1665_v47  ;;  %v1589_v26 = vpop.f32.mrb[59].mxu1  ;;  %1757 = vadd.xlane.f32.xlu1 %v1707_v28  ;;  %v1673_v21 = vmul.f32 1.442695, %v2629_v0  ;;  %v3631_v28 = vpop.xlane.xlu1 %1269 }
 0x364   :  { %v2952_v3 = vpop.eup %2951  ;;  %v1671_v53 = vmul.f32 1.442695, %v1589_v26 }
 0x365   :  { %v2954_v29 = vpop.eup %2953  ;;  %v1709_v25 = vmul.f32 %v2952_v3, %v3567_v37 }
 0x366   :  { %2963 = vpow2.f32 %v1671_v53  ;;  %1755 = vadd.xlane.f32.xlu0 %v1706_v59  ;;  %v2632_v62 = vpop.f32.mrb[60].mxu1  ;;  %v1708_v30 = vmul.f32 %v2954_v29, %v3567_v37 }
 0x367   :  { %2965 = vpow2.f32 %v1669_v27  ;;  %v1677_v38 = vmul.f32 1.442695, %v2632_v62  ;;  %v1599_v13 = vpop.f32.mrb[61].mxu1  ;;  %1761 = vadd.xlane.f32.xlu1 %v1709_v25  ;;  %v3636_v25 = vpop.xlane.xlu0 %1275 }
 0x368   :  { %v2956_v39 = vpop.eup %2955  ;;  %v1675_v41 = vmul.f32 1.442695, %v1599_v13 }
 0x369   :  { %v2958_v60 = vpop.eup %2957  ;;  %2967 = vpow2.f32 %v1677_v38  ;;  %v1711_v36 = vmul.f32 %v2956_v39, %v3567_v37  ;;  %v1274_v38 = vpop.xlane.xlu1 %1273 }
 0x36a   :  { %2969 = vpow2.f32 %v1675_v41  ;;  %1759 = vadd.xlane.f32.xlu0 %v1708_v30  ;;  %v2635_v52 = vpop.f32.mrb[62].mxu1  ;;  %v1710_v44 = vmul.f32 %v2958_v60, %v3567_v37  ;;  %v2978_v41 = vld [vmem:[#allocation5 + $0x78] sm:$0xff]  }
 0x36b   :  { %2971 = vpow2.f32 %v1673_v21  ;;  %v1681_v40 = vmul.f32 1.442695, %v2635_v52  ;;  %v1609_v33 = vpop.f32.mrb[63].mxu1  ;;  %1765 = vadd.xlane.f32.xlu1 %v1711_v36  ;;  %v3641_v39 = vpop.xlane.xlu0 %1279  ;;  %v1815_v30 = vunpack.c.l.bf16 %v2978_v41  ;;  %v1816_v36 = vunpack.c.h.bf16 %v2978_v41 }
 0x36c   :  { %v2960_v34 = vpop.eup %2959  ;;  %v1679_v58 = vmul.f32 1.442695, %v1609_v33  ;;  %v1330_v41 = vsub.f32 0.0, %v3623_v5  ;;  %v1331_v5 = vsub.f32 0.0, %v3631_v28 }
 0x36d   :  { %v2962_v42 = vpop.eup %2961  ;;  %2973 = vpow2.f32 %v1681_v40  ;;  %v1713_v46 = vmul.f32 %v2960_v34, %v3567_v37  ;;  %v1278_v60 = vpop.xlane.xlu1 %1277 }
 0x36e   :  { %2975 = vpow2.f32 %v1679_v58  ;;  %1763 = vadd.xlane.f32.xlu0 %v1710_v44  ;;  %v1712_v32 = vmul.f32 %v2962_v42, %v3567_v37 }
 0x36f   :  { %1769 = vadd.xlane.f32.xlu1 %v1713_v46  ;;  %v3643_v52 = vpop.xlane.xlu0 %1283 }
 0x370   :  { %v2964_v47 = vpop.eup %2963 }
 0x371   :  { %v2966_v7 = vpop.eup %2965  ;;  %v1715_v50 = vmul.f32 %v2964_v47, %v3567_v37  ;;  %v3645_v40 = vpop.xlane.xlu1 %1281 }
 0x372   :  { %1767 = vadd.xlane.f32.xlu0 %v1712_v32  ;;  %v1714_v27 = vmul.f32 %v2966_v7, %v3567_v37 }
 0x373   :  { %v2968_v19 = vpop.eup %2967  ;;  %1773 = vadd.xlane.f32.xlu1 %v1715_v50  ;;  %v3647_v33 = vpop.xlane.xlu0 %1287 }
 0x374   :  { %v2970_v0 = vpop.eup %2969  ;;  %v1718_v26 = vmul.f32 %v2968_v19, %v3567_v37 }
 0x375   :  { %v2972_v3 = vpop.eup %2971  ;;  %v1717_v53 = vmul.f32 %v2970_v0, %v3567_v37  ;;  %v3649_v34 = vpop.xlane.xlu1 %1285 }
 0x376   :  { %1771 = vadd.xlane.f32.xlu0 %v1714_v27  ;;  %v1716_v62 = vmul.f32 %v2972_v3, %v3567_v37 }
 0x377   :  { %v2974_v59 = vpop.eup %2973  ;;  %1777 = vadd.xlane.f32.xlu1 %v1717_v53 }
 0x378   :  { %v2976_v29 = vpop.eup %2975  ;;  %v1720_v21 = vmul.f32 %v2974_v59, %v3567_v37 }
 0x379   :  { %v1719_v13 = vmul.f32 %v2976_v29, %v3567_v37  ;;  %v3651_v37 = vpop.xlane.xlu0 %1291  ;;  %v3653_v58 = vpop.xlane.xlu1 %1289 }
 0x37a   :  { %1775 = vadd.xlane.f32.xlu0 %v1716_v62 }
 0x37b   :  { %1783 = vadd.xlane.f32.xlu1 %v1720_v21 }
 0x37d   :  { %v3655_v44 = vpop.xlane.xlu0 %1295  ;;  %v3657_v42 = vpop.xlane.xlu1 %1293 }
 0x37e   :  { %1779 = vadd.xlane.f32.xlu0 %v1718_v26 }
 0x37f   :  { %1781 = vadd.xlane.f32.xlu1 %v1719_v13 }
 0x381   :  { %v3659_v46 = vpop.xlane.xlu0 %1299  ;;  %v3661_v47 = vpop.xlane.xlu1 %1297 }
 0x382   :  { %1877 = vadd.xlane.f32.xlu0 %v1815_v30  ;;  %v1329_v30 = vsub.f32 0.0, %v1266_v54 }
 0x383   :  { %1879 = vadd.xlane.f32.xlu1 %v1816_v36 }
 0x385   :  { %v3663_v32 = vpop.xlane.xlu0 %1303  ;;  %v3665_v7 = vpop.xlane.xlu1 %1301 }
 0x389   :  { %v3667_v50 = vpop.xlane.xlu0 %1307  ;;  %v3669_v19 = vpop.xlane.xlu1 %1305 }
 0x38d   :  { %v3671_v0 = vpop.xlane.xlu0 %1311  ;;  %v3673_v27 = vpop.xlane.xlu1 %1309 }
 0x391   :  { %v3675_v26 = vpop.xlane.xlu0 %1315  ;;  %v3677_v3 = vpop.xlane.xlu1 %1313 }
 0x392   :  { %3854 = vst [vmem:[#allocation32_spill] sm:$0xff] %v3675_v26 }
 0x395   :  { %v3679_v53 = vpop.xlane.xlu0 %1319  ;;  %v3681_v59 = vpop.xlane.xlu1 %1317 }
 0x396   :  { %3855 = vst [vmem:[#allocation30_spill] sm:$0xff] %v3679_v53 }
 0x399   :  { %v3683_v29 = vpop.xlane.xlu0 %1323  ;;  %v3685_v62 = vpop.xlane.xlu1 %1321 }
 0x39a   :  { %3856 = vst [vmem:[#allocation23_spill] sm:$0xff] %v3683_v29  ;;  %3857 = vst [vmem:[#allocation24_spill] sm:$0xff] %v3685_v62  ;;  %v1332_v62 = vsub.f32 0.0, %v3626_v45 }
 0x39d   :  { %v3687_v21 = vpop.xlane.xlu0 %1327  ;;  %v3689_v13 = vpop.xlane.xlu1 %1325 }
 0x39e   :  { %3858 = vst [vmem:[#allocation31_spill] sm:$0xff] %v3687_v21  ;;  %3859 = vst [vmem:[#allocation29_spill] sm:$0xff] %v3689_v13 }
 0x3ca   :  { %v1724_v36 = vpop.xlane.xlu0 %1723 }
 0x3cb   :  { %v1882_v24 = vadd.f32 %v1724_v36, %v1330_v41  ;;  %v1722_v43 = vpop.xlane.xlu1 %1721  ;;  %v1333_v41 = vsub.f32 0.0, %v1274_v38 }
 0x3cc   :  { %v1881_v6 = vadd.f32 %v1722_v43, %v1329_v30 }
 0x3cd   :  { %v1914_v2 = vmul.f32 %v1882_v24, %v3540_v14 }
 0x3ce   :  { %v1913_v53 = vmul.f32 %v1881_v6, %v3538_v49 }
 0x3cf   :  { %v1947_v29 = vsel %vm1945_vm0, %v1914_v2, 0.0  ;;  %v1728_v63 = vpop.xlane.xlu0 %1727  ;;  %v1335_v2 = vsub.f32 0.0, %v1278_v60 }
 0x3d0   :  { %v1946_v21 = vsel %vm1945_vm0, %v1913_v53, 0.0  ;;  %v1884_v54 = vadd.f32 %v1728_v63, %v1332_v62 }
 0x3d1   :  { %v1948_v13 = vadd.f32 %v1947_v29, %v1946_v21  ;;  %v1334_v29 = vsub.f32 0.0, %v3636_v25  ;;  %v1336_v21 = vsub.f32 0.0, %v3641_v39 }
 0x3d2   :  { %v1916_v43 = vmul.f32 %v1884_v54, %v3544_v8  ;;  %v1337_v8 = vsub.f32 0.0, %v3645_v40  ;;  %v1338_v40 = vsub.f32 0.0, %v3643_v52 }
 0x3d3   :  { %v1726_v31 = vpop.xlane.xlu0 %1725 }
 0x3d4   :  { %v1883_v36 = vadd.f32 %v1726_v31, %v1331_v5  ;;  %v1730_v26 = vpop.xlane.xlu1 %1729  ;;  %v1951_v63 = vsel %vm1945_vm0, %v1916_v43, 0.0 }
 0x3d5   :  { %v1885_v49 = vadd.f32 %v1730_v26, %v1333_v41 }
 0x3d6   :  { %v1915_v14 = vmul.f32 %v1883_v36, %v3542_v4 }
 0x3d7   :  { %v3700_v6 = vpop.xlane.xlu0 %1875  ;;  %v1917_v28 = vmul.f32 %v1885_v49, %v3546_v9  ;;  %v1339_v9 = vsub.f32 0.0, %v3649_v34 }
 0x3d8   :  { %v1949_v24 = vsel %vm1945_vm0, %v1915_v14, 0.0  ;;  %v1734_v45 = vpop.xlane.xlu1 %1733 }
 0x3d9   :  { %v1950_v53 = vadd.f32 %v1949_v24, %v1948_v13  ;;  %v1887_v31 = vadd.f32 %v1734_v45, %v1335_v2  ;;  %v1953_v60 = vsel %vm1945_vm0, %v1917_v28, 0.0  ;;  %v1341_v45 = vsub.f32 0.0, %v3653_v58 }
 0x3db   :  { %v1952_v38 = vadd.f32 %v1951_v63, %v1950_v53  ;;  %v1732_v62 = vpop.xlane.xlu0 %1731  ;;  %v1919_v30 = vmul.f32 %v1887_v31, %v3550_v12  ;;  %v1340_v63 = vsub.f32 0.0, %v3647_v33 }
 0x3dc   :  { %v1886_v4 = vadd.f32 %v1732_v62, %v1334_v29  ;;  %v1738_v26 = vpop.xlane.xlu1 %1737 }
 0x3dd   :  { %v1889_v25 = vadd.f32 %v1738_v26, %v1337_v8  ;;  %v1954_v5 = vadd.f32 %v1953_v60, %v1952_v38  ;;  %v1957_v39 = vsel %vm1945_vm0, %v1919_v30, 0.0  ;;  %v1343_v8 = vsub.f32 0.0, %v3657_v42 }
 0x3de   :  { %v1918_v13 = vmul.f32 %v1886_v4, %v3548_v51 }
 0x3df   :  { %v1736_v54 = vpop.xlane.xlu0 %1735  ;;  %v1921_v49 = vmul.f32 %v1889_v25, %v3554_v55 }
 0x3e0   :  { %v1955_v41 = vsel %vm1945_vm0, %v1918_v13, 0.0  ;;  %v1888_v36 = vadd.f32 %v1736_v54, %v1336_v21  ;;  %v1742_v43 = vpop.xlane.xlu1 %1741  ;;  %v1342_v21 = vsub.f32 0.0, %v3651_v37 }
 0x3e1   :  { %v1956_v14 = vadd.f32 %v1955_v41, %v1954_v5  ;;  %v1891_v2 = vadd.f32 %v1742_v43, %v1339_v9  ;;  %v1961_v52 = vsel %vm1945_vm0, %v1921_v49, 0.0  ;;  %v1345_v5 = vsub.f32 0.0, %v3661_v47 }
 0x3e2   :  { %v1920_v12 = vmul.f32 %v1888_v36, %v3552_v57  ;;  %v1344_v41 = vsub.f32 0.0, %v3655_v44 }
 0x3e3   :  { %v1958_v51 = vadd.f32 %v1957_v39, %v1956_v14  ;;  %v1740_v24 = vpop.xlane.xlu0 %1739  ;;  %v1923_v31 = vmul.f32 %v1891_v2, %v3558_v61  ;;  %v1347_v39 = vsub.f32 0.0, %v3665_v7  ;;  %v1346_v2 = vsub.f32 0.0, %v3659_v46 }
 0x3e4   :  { %v1959_v34 = vsel %vm1945_vm0, %v1920_v12, 0.0  ;;  %v1890_v53 = vadd.f32 %v1740_v24, %v1338_v40  ;;  %v1746_v29 = vpop.xlane.xlu1 %1745 }
 0x3e5   :  { %v1960_v28 = vadd.f32 %v1959_v34, %v1958_v51  ;;  %v1893_v38 = vadd.f32 %v1746_v29, %v1341_v45  ;;  %v1965_v33 = vsel %vm1945_vm0, %v1923_v31, 0.0 }
 0x3e6   :  { %v1922_v55 = vmul.f32 %v1890_v53, %v3556_v48  ;;  %v1349_v53 = vsub.f32 0.0, %v3669_v19 }
 0x3e7   :  { %v1962_v57 = vadd.f32 %v1961_v52, %v1960_v28  ;;  %v1744_v62 = vpop.xlane.xlu0 %1743  ;;  %v1925_v30 = vmul.f32 %v1893_v38, %v3562_v11  ;;  %v1348_v28 = vsub.f32 0.0, %v3663_v32 }
 0x3e8   :  { %v1963_v58 = vsel %vm1945_vm0, %v1922_v55, 0.0  ;;  %v1892_v4 = vadd.f32 %v1744_v62, %v1340_v63  ;;  %v1750_v26 = vpop.xlane.xlu1 %1749 }
 0x3e9   :  { %v1964_v60 = vadd.f32 %v1963_v58, %v1962_v57  ;;  %v1895_v13 = vadd.f32 %v1750_v26, %v1343_v8  ;;  %v1969_v37 = vsel %vm1945_vm0, %v1925_v30, 0.0  ;;  %v1351_v57 = vsub.f32 0.0, %v3673_v27 }
 0x3ea   :  { %v1924_v61 = vmul.f32 %v1892_v4, %v3560_v35  ;;  %v1350_v58 = vsub.f32 0.0, %v3667_v50 }
 0x3eb   :  { %v1966_v48 = vadd.f32 %v1965_v33, %v1964_v60  ;;  %v1748_v25 = vpop.xlane.xlu0 %1747  ;;  %v1927_v43 = vmul.f32 %v1895_v13, %v3573_v22  ;;  %v1353_v33 = vsub.f32 0.0, %v3677_v3  ;;  %v1352_v13 = vsub.f32 0.0, %v3671_v0 }
 0x3ec   :  { %v1967_v42 = vsel %vm1945_vm0, %v1924_v61, 0.0  ;;  %v1894_v54 = vadd.f32 %v1748_v25, %v1342_v21  ;;  %v1754_v9 = vpop.xlane.xlu1 %1753 }
 0x3ed   :  { %v1968_v36 = vadd.f32 %v1967_v42, %v1966_v48  ;;  %v1897_v40 = vadd.f32 %v1754_v9, %v1345_v5  ;;  %v1973_v44 = vsel %vm1945_vm0, %v1927_v43, 0.0 }
 0x3ee   :  { %v1926_v11 = vmul.f32 %v1894_v54, %v3570_v56  ;;  %v1355_v54 = vsub.f32 0.0, %v3681_v59 }
 0x3ef   :  { %v1970_v35 = vadd.f32 %v1969_v37, %v1968_v36  ;;  %v1752_v14 = vpop.xlane.xlu0 %1751  ;;  %v1929_v24 = vmul.f32 %v1897_v40, %v3578_v17  ;;  %v3860_v36 = vld [vmem:[#allocation32_spill] sm:$0xff] }
 0x3f0   :  { %v1971_v47 = vsel %vm1945_vm0, %v1926_v11, 0.0  ;;  %v1896_v49 = vadd.f32 %v1752_v14, %v1344_v41  ;;  %v1758_v12 = vpop.xlane.xlu1 %1757  ;;  %v1354_v37 = vsub.f32 0.0, %v3860_v36  ;;  %v3861_v11 = vld [vmem:[#allocation20_spill] sm:$0xff] }
 0x3f1   :  { %v1972_v51 = vadd.f32 %v1971_v47, %v1970_v35  ;;  %v1899_v45 = vadd.f32 %v1758_v12, %v1347_v39  ;;  %v1977_v46 = vsel %vm1945_vm0, %v1929_v24, 0.0  ;;  %v3862_v35 = vld [vmem:[#allocation19_spill] sm:$0xff]  ;;  %v3863_v47 = vld [vmem:[#allocation24_spill] sm:$0xff] }
 0x3f2   :  { %v1928_v22 = vmul.f32 %v1896_v49, %v3576_v20  ;;  %v1357_v49 = vsub.f32 0.0, %v3863_v47 }
 0x3f3   :  { %v1974_v56 = vadd.f32 %v1973_v44, %v1972_v51  ;;  %v1756_v34 = vpop.xlane.xlu0 %1755  ;;  %v1931_v31 = vmul.f32 %v1899_v45, %v3584_v18  ;;  %v3864_v51 = vld [vmem:[#allocation30_spill] sm:$0xff]  ;;  %v3865_v45 = vld [vmem:[#allocation27_spill] sm:$0xff] }
 0x3f4   :  { %v1975_v7 = vsel %vm1945_vm0, %v1928_v22, 0.0  ;;  %v1898_v29 = vadd.f32 %v1756_v34, %v1346_v2  ;;  %v1762_v63 = vpop.xlane.xlu1 %1761  ;;  %v1356_v44 = vsub.f32 0.0, %v3864_v51  ;;  %v3866_v34 = vld [vmem:[#allocation28_spill] sm:$0xff] }
 0x3f5   :  { %v1976_v52 = vadd.f32 %v1975_v7, %v1974_v56  ;;  %v1901_v55 = vadd.f32 %v1762_v63, %v1349_v53  ;;  %v1981_v32 = vsel %vm1945_vm0, %v1931_v31, 0.0 }
 0x3f6   :  { %v1930_v17 = vmul.f32 %v1898_v29, %v3582_v23 }
 0x3f7   :  { %v1978_v20 = vadd.f32 %v1977_v46, %v1976_v52  ;;  %v1760_v38 = vpop.xlane.xlu0 %1759  ;;  %v1933_v26 = vmul.f32 %v1901_v55, %v3591_v16 }
 0x3f8   :  { %v1979_v19 = vsel %vm1945_vm0, %v1930_v17, 0.0  ;;  %v1900_v62 = vadd.f32 %v1760_v38, %v1348_v28  ;;  %v1766_v8 = vpop.xlane.xlu1 %1765  ;;  %v3867_v17 = vld [vmem:[#allocation23_spill] sm:$0xff]  ;;  %v3868_v38 = vld [vmem:[#allocation22_spill] sm:$0xff] }
 0x3f9   :  { %v1980_v4 = vadd.f32 %v1979_v19, %v1978_v20  ;;  %v1903_v21 = vadd.f32 %v1766_v8, %v1351_v57  ;;  %v1985_v50 = vsel %vm1945_vm0, %v1933_v26, 0.0  ;;  %v1358_v55 = vsub.f32 0.0, %v3867_v17  ;;  %v3869_v19 = vld [vmem:[#allocation21_spill] sm:$0xff] }
 0x3fa   :  { %v1932_v18 = vmul.f32 %v1900_v62, %v3589_v15  ;;  %v3870_v8 = vld [vmem:[#allocation29_spill] sm:$0xff] }
 0x3fb   :  { %v1982_v23 = vadd.f32 %v1981_v32, %v1980_v4  ;;  %v1764_v60 = vpop.xlane.xlu0 %1763  ;;  %v1935_v25 = vmul.f32 %v1903_v21, %v3598_v10 }
 0x3fc   :  { %v1983_v27 = vsel %vm1945_vm0, %v1932_v18, 0.0  ;;  %v1902_v30 = vadd.f32 %v1764_v60, %v1350_v58  ;;  %v1770_v61 = vpop.xlane.xlu1 %1769  ;;  %v1359_v58 = vsub.f32 0.0, %v3870_v8 }
 0x3fd   :  { %v1984_v48 = vadd.f32 %v1983_v27, %v1982_v23  ;;  %v1905_v5 = vadd.f32 %v1770_v61, %v1353_v33  ;;  %v1989_v0 = vsel %vm1945_vm0, %v1935_v25, 0.0  ;;  %v3871_v23 = vld [vmem:[#allocation31_spill] sm:$0xff] }
 0x3fe   :  { %v1934_v16 = vmul.f32 %v1902_v30, %v3595_v1  ;;  %v1360_v60 = vsub.f32 0.0, %v3871_v23 }
 0x3ff   :  { %v1986_v15 = vadd.f32 %v1985_v50, %v1984_v48  ;;  %v1768_v42 = vpop.xlane.xlu0 %1767  ;;  %v1937_v40 = vmul.f32 %v1905_v5, %v3861_v11 }
 0x400   :  { %v1987_v3 = vsel %vm1945_vm0, %v1934_v16, 0.0  ;;  %v1904_v9 = vadd.f32 %v1768_v42, %v1352_v13  ;;  %v1774_v41 = vpop.xlane.xlu1 %1773 }
 0x401   :  { %v1988_v43 = vadd.f32 %v1987_v3, %v1986_v15  ;;  %v1907_v14 = vadd.f32 %v1774_v41, %v1355_v54  ;;  %v1993_v22 = vsel %vm1945_vm0, %v1937_v40, 0.0 }
 0x402   :  { %v1936_v10 = vmul.f32 %v1904_v9, %v3862_v35 }
 0x403   :  { %v1990_v1 = vadd.f32 %v1989_v0, %v1988_v43  ;;  %v1772_v39 = vpop.xlane.xlu0 %1771  ;;  %v1939_v56 = vmul.f32 %v1907_v14, %v3865_v45 }
 0x404   :  { %v1991_v59 = vsel %vm1945_vm0, %v1936_v10, 0.0  ;;  %v1906_v12 = vadd.f32 %v1772_v39, %v1354_v37  ;;  %v1778_v2 = vpop.xlane.xlu1 %1777 }
 0x405   :  { %v1992_v24 = vadd.f32 %v1991_v59, %v1990_v1  ;;  %v1909_v7 = vadd.f32 %v1778_v2, %v1357_v49  ;;  %v1997_v20 = vsel %vm1945_vm0, %v1939_v56, 0.0 }
 0x406   :  { %v1938_v53 = vmul.f32 %v1906_v12, %v3866_v34 }
 0x407   :  { %v1994_v29 = vadd.f32 %v1993_v22, %v1992_v24  ;;  %v1776_v63 = vpop.xlane.xlu0 %1775  ;;  %v1941_v57 = vmul.f32 %v1909_v7, %v3868_v38 }
 0x408   :  { %v1995_v28 = vsel %vm1945_vm0, %v1938_v53, 0.0  ;;  %v1908_v52 = vadd.f32 %v1776_v63, %v1356_v44  ;;  %v1784_v46 = vpop.xlane.xlu1 %1783 }
 0x409   :  { %v1996_v31 = vadd.f32 %v1995_v28, %v1994_v29  ;;  %v2001_v30 = vsel %vm1945_vm0, %v1941_v57, 0.0  ;;  %v1912_v13 = vadd.f32 %v1784_v46, %v1360_v60 }
 0x40a   :  { %v1940_v62 = vmul.f32 %v1908_v52, %v3869_v19 }
 0x40b   :  { %v1998_v4 = vadd.f32 %v1997_v20, %v1996_v31  ;;  %v1780_v32 = vpop.xlane.xlu0 %1779 }
 0x40c   :  { %v1999_v26 = vsel %vm1945_vm0, %v1940_v62, 0.0  ;;  %v1910_v18 = vadd.f32 %v1780_v32, %v1358_v55  ;;  %v1782_v21 = vpop.xlane.xlu1 %1781 }
 0x40d   :  { %v2000_v33 = vadd.f32 %v1999_v26, %v1998_v4  ;;  %v1911_v27 = vadd.f32 %v1782_v21, %v1359_v58 }
 0x40e   :  { %v1942_v61 = vmul.f32 %v1910_v18, %v3700_v6 }
 0x40f   :  { %v1878_v48 = vpop.xlane.xlu0 %1877  ;;  %v2002_v50 = vadd.f32 %v2001_v30, %v2000_v33 }
 0x410   :  { %v2003_v25 = vsel %vm1945_vm0, %v1942_v61, 0.0  ;;  %v1943_v16 = vmul.f32 %v1911_v27, %v1878_v48  ;;  %v1880_v5 = vpop.xlane.xlu1 %1879 }
 0x411   :  { %v1944_v15 = vmul.f32 %v1912_v13, %v1880_v5  ;;  %v2004_v42 = vadd.f32 %v2003_v25, %v2002_v50 }
 0x412   :  { %v2005_v54 = vsel %vm1945_vm0, %v1943_v16, 0.0 }
 0x413   :  { %v2006_v3 = vadd.f32 %v2005_v54, %v2004_v42  ;;  %v2007_v9 = vsel %vm1945_vm0, %v1944_v15, 0.0 }
 0x415   :  { %v2008_v41 = vadd.f32 %v2007_v9, %v2006_v3 }
 0x417   :  { %2009 = vadd.xlane.f32.xlu0 %v2008_v41 }
 0x4a4   :  { %v2010_v36 = vpop.xlane.xlu0 %2009 }
 0x4a5   :  { %v2011_v37 = vrot.slane %v2010_v36, 4 }
 0x4a7   :  { %v2012_v43 = vadd.f32 %v2011_v37, %v2010_v36 }
 0x4a9   :  { %v2013_v6 = vrot.slane %v2012_v43, 2 }
 0x4ab   :  { %v2014_v0 = vadd.f32 %v2013_v6, %v2012_v43 }
 0x4ad   :  { %v2015_v11 = vrot.slane %v2014_v0, 1 }
 0x4af   :  { %v2016_v40 = vadd.f32 %v2015_v11, %v2014_v0 }
 0x4b1   :  { %2732 = vpush %v2016_v40 }
 0x4e2   :  { %s2733_s28 = spop %2732 }
 0x4e3   :  { %v2018_v35 = vstv %s2733_s28 }
 0x4e4   :  { %2019 = vst [vmem:[#allocation13] sm:$0xff] %v2018_v35 }
 0x4e5   :  { %3122 = shalt.err (!%p3119_p10)
}
 0x4e6   :  { %s3123_s30 = scalar_lea.hbm %s3803_s7, 128 }
 0x4e7   :  { %p3124_p11 = scmp.ne.s32.totalorder %s3803_s7, %s3123_s30  ;;  %p3127_p12 = scmp.lt.u32.totalorder %s3123_s30, %s3803_s7 }
 0x4e9   :  { %p3129_p13 = pnand %p3127_p12, %p3124_p11 }
 0x4eb   :  { %3132 = shalt.err (!%p3129_p13)
}
 0x4ec   :  { %2029 = dma.vmem_to_hbm [thread:$0]  %s2027_s12, 128, %s3803_s7, [#allocation4]  }
 0x4ed   :  { %3141 = dma.done.wait [#allocation4], 128  }
 0x4ee   :  { %3142 = vsyncadd [#allocation4], 4294967168 }
 0x4ef   :  { %2033 = vsyncpa [#allocation3], 1 }
 0x4f0   :  { %2034 = vsyncpa [#allocation6], 1 }
 0x4f1   :  { %2035 = vsyncpa [#allocation9], 1 }
 0x4f2   :  { %2036 = vsyncpa [#allocation12], 1 }
 0x4f3   :  { %2037 = vsyncpa [#allocation4], 1 }

</bundles_post_ra>
